<compile_context>
chip_gen: v7x
topology: tpu7x:2x2x1
jax: 0.10.0
libtpu: 0.0.40
codegen_flags: <defaults>
</compile_context>

<pallas_src>
import hashlib

import jax
import jax.numpy as jnp
from jax import lax
from jax.experimental import pallas as pl
from jax.experimental.pallas import tpu as pltpu

# Module hyper-parameters (small, synthetic).
NUM_EMBEDDINGS = 64
EMBEDDING_DIM = 32
NUM_HASHES = 2
SUB_DIM = EMBEDDING_DIM // NUM_HASHES

LANE = 128           # TPU lane width; output rows are packed to this width.
TILE_GROUPS = 1024   # 1024 groups * 4 tokens = 4096 tokens per grid step (sweep).


def hash_token(token: str, hash_index: int, num_embeddings: int) -> int:
    """Same hashing scheme as HashEmbedding.hash_token (md5 of f'{token}_{i}')."""
    hash_input = f"{token}_{hash_index}".encode("utf-8")
    hash_value = int(hashlib.md5(hash_input).hexdigest(), 16)
    return hash_value % num_embeddings


def _round_up(x: int, m: int) -> int:
    return ((x + m - 1) // m) * m


def pack_hash_tables(tables: jax.Array, group: int) -> jax.Array:
    """Pack per-hash tables into one (group*K, group*embedding_dim) matrix.

    tables: (num_hashes, num_embeddings, sub_dim).
    Row (g*K + h*E + e) holds tables[h, e, :] in columns
    [g*embedding_dim + h*sub_dim : g*embedding_dim + (h+1)*sub_dim]: a block-
    diagonal layout over (group position) x (hash).  One matmul against it
    performs gather + concat(dim=1) + packing of `group` consecutive tokens
    into a single 128-lane output row.  Built ONCE, outside the per-call path.
    """
    num_hashes, num_embeddings, sub_dim = tables.shape
    embedding_dim = num_hashes * sub_dim
    k_dim = num_hashes * num_embeddings
    small = jnp.zeros((k_dim, embedding_dim), dtype=tables.dtype)
    for h in range(num_hashes):
        small = small.at[
            h * num_embeddings : (h + 1) * num_embeddings,
            h * sub_dim : (h + 1) * sub_dim,
        ].set(tables[h])
    # Block-diagonal replication over the group-position axis.
    return jnp.kron(jnp.eye(group, dtype=tables.dtype), small)


def _hash_embed_kernel(idx_ref, table_ref, out_ref):
    """One batch tile: vectorized one-hot gather on the MXU.

    idx_ref   : VMEM (tile_groups, group*num_hashes) int32 -- per output row,
                the packed-table rows to sum (disjoint column blocks, so the
                sum IS the concatenated, token-packed embedding row)
    table_ref : VMEM (group*K, group*embedding_dim) f32 packed table
    out_ref   : VMEM (tile_groups, group*embedding_dim) -- 128 lanes wide
    """
    idx = idx_ref[...]                      # (tile_groups, group*num_hashes)
    table = table_ref[...]                  # (k_big, 128)
    tile_groups, n_sel = idx.shape
    k_big = table.shape[0]

    cols = lax.broadcasted_iota(jnp.int32, (tile_groups, k_big), 1)
    hit = cols == idx[:, 0:1]
    for j in range(1, n_sel):               # n_sel = group*num_hashes, static, small
        hit = hit | (cols == idx[:, j : j + 1])

    # HIGHEST precision keeps the f32 table exact on the MXU (the 0/1 one-hot
    # is exact in any decomposition), so the gather matches the reference.
    out_ref[...] = jnp.dot(
        hit.astype(table.dtype),
        table,
        precision=lax.Precision.HIGHEST,
        preferred_element_type=jnp.float32,
    ).astype(out_ref.dtype)


def _pick_tile_groups(n_groups: int) -> int:
    """Sublane-aligned tile; keeps >= 2 grid steps when there is enough work."""
    if n_groups >= 2 * TILE_GROUPS:
        return TILE_GROUPS
    if n_groups >= 16:
        # Split into ~2 tiles so the "parallel" axis feeds both v7x TensorCores.
        return _round_up(-(-n_groups // 2), 8)
    return _round_up(n_groups, 8)


def hash_embedding_forward(
    packed_table: jax.Array,
    indices: jax.Array,
    *,
    num_embeddings: int,
    tile_groups=None,
) -> jax.Array:
    """packed_table from pack_hash_tables; indices: (num_hashes, batch) int32.

    Returns (batch, embedding_dim) float32 == torch.cat([emb_h(idx_h)], dim=1).
    """
    num_hashes, batch = indices.shape
    k_dim = num_hashes * num_embeddings
    k_big, lane_dim = packed_table.shape
    group = k_big // k_dim
    embedding_dim = lane_dim // group

    # Per-token row index into the (K, embedding_dim) per-hash block layout.
    offsets = (jnp.arange(num_hashes, dtype=jnp.int32) * num_embeddings)[:, None]
    tok_idx = (indices.astype(jnp.int32) + offsets).T            # (batch, num_hashes)

    n_groups = -(-batch // group)
    tg = tile_groups if tile_groups is not None else _pick_tile_groups(n_groups)
    groups_padded = _round_up(n_groups, tg)
    batch_padded = groups_padded * group

    if batch_padded != batch:
        # Pad index 0 gathers a valid row; the garbage lands only in output
        # rows >= batch after the final reshape and is sliced off below.  Do
        # NOT alias this output in place without masking those rows.
        tok_idx = jnp.pad(tok_idx, ((0, batch_padded - batch), (0, 0)))

    # Token at position g inside its group selects from row block g*K.
    g_off = (jnp.arange(group, dtype=jnp.int32) * k_dim)[None, :, None]
    grp_idx = tok_idx.reshape(groups_padded, group, num_hashes) + g_off
    grp_idx = grp_idx.reshape(groups_padded, group * num_hashes)

    out = pl.pallas_call(
        _hash_embed_kernel,
        out_shape=jax.ShapeDtypeStruct((groups_padded, lane_dim), packed_table.dtype),
        grid=(groups_padded // tg,),
        in_specs=[
            # Per-tile index block (last dim == full array dim -> (8,128)-ok).
            pl.BlockSpec((tg, group * num_hashes), lambda i: (i, 0)),
            # Constant-index packed table: DMA'd once across the grid.  Default
            # double-buffering is fine at 256 KiB; single-buffer / scratch-DMA
            # it for the large-vocab path (matters most on v7x's 64 MiB VMEM).
            pl.BlockSpec((k_big, lane_dim), lambda i: (0, 0)),
        ],
        out_specs=pl.BlockSpec((tg, lane_dim), lambda i: (i, 0)),
        compiler_params=pltpu.CompilerParams(dimension_semantics=("parallel",)),
    )(grp_idx, packed_table)

    # (groups, group*embedding_dim) row-major == (batch_padded, embedding_dim).
    return out.reshape(batch_padded, embedding_dim)[:batch]


if __name__ == "__main__":
    key = jax.random.PRNGKey(0)

    # Deterministic init: num_hashes tables of (num_embeddings, embedding_dim //
    # num_hashes), N(0, 0.02) like nn.init.normal_.
    table_keys = jax.random.split(key, NUM_HASHES)
    tables = jnp.stack(
        [
            0.02 * jax.random.normal(k, (NUM_EMBEDDINGS, SUB_DIM), dtype=jnp.float32)
            for k in table_keys
        ],
        axis=0,
    )  # (num_hashes, num_embeddings, sub_dim)

    # G consecutive tokens packed per 128-lane output row.
    assert LANE % EMBEDDING_DIM == 0
    group = LANE // EMBEDDING_DIM

    # Pack the block-diagonal table ONCE (hoisted out of the per-call wrapper).
    packed_table = pack_hash_tables(tables, group)

    # Small batch of token strings (the module's input is List[str]).
    tokens = ["<html>", "<body>", "div", "span", "class", "href", "</body>", "</html>"]
    batch = len(tokens)

    # Host-side md5 hashing -> int32 index matrix (num_hashes, batch).
    indices = jnp.array(
        [[hash_token(t, h, NUM_EMBEDDINGS) for t in tokens] for h in range(NUM_HASHES)],
        dtype=jnp.int32,
    )

    result = hash_embedding_forward(
        packed_table, indices, num_embeddings=NUM_EMBEDDINGS
    )
    result = jax.block_until_ready(result)

    # Sanity check against a pure-JAX reference gather + concat(dim=1).
    ref = jnp.concatenate(
        [jnp.take(tables[h], indices[h], axis=0) for h in range(NUM_HASHES)], axis=1
    )
    assert result.shape == (batch, EMBEDDING_DIM), result.shape
    assert jnp.allclose(result, ref, rtol=1e-6, atol=1e-6), "mismatch vs reference gather"

    print("KERNEL_OK")
</pallas_src>

<mosaic_0001>
module attributes {stable_mosaic.version = 11 : i64} {
  func.func @_hash_embed_kernel(%arg0: i32, %arg1: memref<8x8xi32, #tpu.memory_space<vmem>>, %arg2: memref<512x128xf32, #tpu.memory_space<vmem>>, %arg3: memref<8x128xf32, #tpu.memory_space<vmem>>) attributes {dimension_semantics = [#tpu.dimension_semantics<parallel>], iteration_bounds = array<i64: 1>, scalar_prefetch = 0 : i64, scratch_operands = 0 : i64, tpu.core_type = #tpu.core_type<tc>, window_params = [{transform_indices = @transform_0, window_bounds = array<i64: 8, 8>}, {pipeline_mode = #tpu.pipeline_mode<synchronous>, transform_indices = @transform_1, window_bounds = array<i64: 512, 128>}, {transform_indices = @transform_2, window_bounds = array<i64: 8, 128>}]} {
    %c0 = arith.constant 0 : index
    %c0_0 = arith.constant 0 : index
    %0 = vector.load %arg1[%c0, %c0_0] : memref<8x8xi32, #tpu.memory_space<vmem>>, vector<8x8xi32>
    %c0_1 = arith.constant 0 : index
    %c0_2 = arith.constant 0 : index
    %1 = vector.load %arg2[%c0_1, %c0_2] : memref<512x128xf32, #tpu.memory_space<vmem>>, vector<512x128xf32>
    %2 = tpu.iota {dimensions = array<i32: 1>} : vector<8x512xi32>
    %3 = vector.extract_strided_slice %0 {offsets = [0, 0], sizes = [8, 1], strides = [1, 1]} : vector<8x8xi32> to vector<8x1xi32>
    %4 = vector.broadcast %3 : vector<8x1xi32> to vector<8x512xi32>
    %5 = arith.cmpi eq, %2, %4 : vector<8x512xi32>
    %6 = vector.extract_strided_slice %0 {offsets = [0, 1], sizes = [8, 1], strides = [1, 1]} : vector<8x8xi32> to vector<8x1xi32>
    %7 = vector.broadcast %6 : vector<8x1xi32> to vector<8x512xi32>
    %8 = arith.cmpi eq, %2, %7 : vector<8x512xi32>
    %9 = arith.ori %5, %8 : vector<8x512xi1>
    %10 = vector.extract_strided_slice %0 {offsets = [0, 2], sizes = [8, 1], strides = [1, 1]} : vector<8x8xi32> to vector<8x1xi32>
    %11 = vector.broadcast %10 : vector<8x1xi32> to vector<8x512xi32>
    %12 = arith.cmpi eq, %2, %11 : vector<8x512xi32>
    %13 = arith.ori %9, %12 : vector<8x512xi1>
    %14 = vector.extract_strided_slice %0 {offsets = [0, 3], sizes = [8, 1], strides = [1, 1]} : vector<8x8xi32> to vector<8x1xi32>
    %15 = vector.broadcast %14 : vector<8x1xi32> to vector<8x512xi32>
    %16 = arith.cmpi eq, %2, %15 : vector<8x512xi32>
    %17 = arith.ori %13, %16 : vector<8x512xi1>
    %18 = vector.extract_strided_slice %0 {offsets = [0, 4], sizes = [8, 1], strides = [1, 1]} : vector<8x8xi32> to vector<8x1xi32>
    %19 = vector.broadcast %18 : vector<8x1xi32> to vector<8x512xi32>
    %20 = arith.cmpi eq, %2, %19 : vector<8x512xi32>
    %21 = arith.ori %17, %20 : vector<8x512xi1>
    %22 = vector.extract_strided_slice %0 {offsets = [0, 5], sizes = [8, 1], strides = [1, 1]} : vector<8x8xi32> to vector<8x1xi32>
    %23 = vector.broadcast %22 : vector<8x1xi32> to vector<8x512xi32>
    %24 = arith.cmpi eq, %2, %23 : vector<8x512xi32>
    %25 = arith.ori %21, %24 : vector<8x512xi1>
    %26 = vector.extract_strided_slice %0 {offsets = [0, 6], sizes = [8, 1], strides = [1, 1]} : vector<8x8xi32> to vector<8x1xi32>
    %27 = vector.broadcast %26 : vector<8x1xi32> to vector<8x512xi32>
    %28 = arith.cmpi eq, %2, %27 : vector<8x512xi32>
    %29 = arith.ori %25, %28 : vector<8x512xi1>
    %30 = vector.extract_strided_slice %0 {offsets = [0, 7], sizes = [8, 1], strides = [1, 1]} : vector<8x8xi32> to vector<8x1xi32>
    %31 = vector.broadcast %30 : vector<8x1xi32> to vector<8x512xi32>
    %32 = arith.cmpi eq, %2, %31 : vector<8x512xi32>
    %33 = arith.ori %29, %32 : vector<8x512xi1>
    %34 = arith.extui %33 : vector<8x512xi1> to vector<8x512xi32>
    %35 = arith.sitofp %34 : vector<8x512xi32> to vector<8x512xf32>
    %cst = arith.constant dense<0.000000e+00> : vector<8x128xf32>
    %36 = tpu.matmul %35, %1, %cst {dimension_numbers = #tpu.dot_dimension_numbers<[1], [0], [0], [1], [0, 0, 1, 1], [], []>, precision = #tpu.contract_precision<fp32>} : vector<8x512xf32>, vector<512x128xf32>, vector<8x128xf32> -> vector<8x128xf32>
    %c0_3 = arith.constant 0 : index
    %c0_4 = arith.constant 0 : index
    %37 = vector.load %arg3[%c0_3, %c0_4] : memref<8x128xf32, #tpu.memory_space<vmem>>, vector<8x128xf32>
    tpu.vector_store %arg3[%c0_3, %c0_4], %36 {strides = array<i32>} : memref<8x128xf32, #tpu.memory_space<vmem>>, vector<8x128xf32>,
    return
  }
  func.func @transform_0(%arg0: i32) -> (i32, i32) {
    %c0_i32 = arith.constant 0 : i32
    %c0_i32_0 = arith.constant 0 : i32
    return %arg0, %c0_i32 : i32, i32
  }
  func.func @transform_1(%arg0: i32) -> (i32, i32) {
    %c0_i32 = arith.constant 0 : i32
    %c0_i32_0 = arith.constant 0 : i32
    %c0_i32_1 = arith.constant 0 : i32
    return %c0_i32, %c0_i32_0 : i32, i32
  }
  func.func @transform_2(%arg0: i32) -> (i32, i32) {
    %c0_i32 = arith.constant 0 : i32
    %c0_i32_0 = arith.constant 0 : i32
    return %arg0, %c0_i32 : i32, i32
  }
}

</mosaic_0001>

<bundles_post_ra>
// kernel: tpu_custom_call.1
= control target key start
LH: loop header
LB: loop body
LE: loop exit
PB: predicated region body
PF: predicated region fallthrough
CT: control target
= control target key end

     0   :  { %7 = vsyncpa [#allocation3], 0  ;;  %s4263_s0 = inlined_call_operand.hbm [shape: s32[8,8], index: 0, kind: input, shape index: {}]   ;;  %s4264_s1 = inlined_call_operand.hbm [shape: f32[512,128], index: 1, kind: input, shape index: {}]   ;;  %s4265_s2 = inlined_call_operand.hbm [shape: f32[8,128], index: 2, kind: output, shape index: {}]  }
   0x1   :  { %8 = vsyncpa [#allocation6], 0 }
   0x2   :  { %9 = vsyncpa [#allocation4], 0  ;;  %s2844_s9 = smov [#allocation2]   ;;  %s2845_s11 = smov [#allocation5]  }
   0x3   :  { %s16_s10 = sshll.u32 %s2844_s9, 4  ;;  %s25_s12 = sshll.u32 %s2845_s11, 4  ;;  %s17_s10 = int_to_ptr.vmem [resolvable:$true] %s16_s10  ;;  %s2873_s12 = int_to_ptr.vmem [resolvable:$true] %s25_s12 }
   0x4   :  { %s2772_s15 = scalar_lea.hbm %s4263_s0, 128 }
   0x5   :  { %p2773_p0 = scmp.ne.s32.totalorder %s4263_s0, %s2772_s15  ;;  %p2776_p1 = scmp.lt.u32.totalorder %s2772_s15, %s4263_s0 }
   0x7   :  { %p2778_p2 = pnand %p2776_p1, %p2773_p0 }
   0x9   :  { %2781 = shalt.err (!%p2778_p2)
}
   0xa   :  { %s2782_s20 = scalar_lea.vmem %s17_s10, 128  ;;  %p2787_p4 = scmp.lt.s32.totalorder %s17_s10, %s17_s10 }
   0xb   :  { %p2783_p3 = scmp.ne.s32.totalorder %s17_s10, %s2782_s20  ;;  %p2788_p5 = scmp.lt.s32.totalorder %s2782_s20, %s2782_s20 }
   0xd   :  { %p2789_p6 = por %p2788_p5, %p2787_p4 }
   0xf   :  { %p2790_p7 = pnand %p2789_p6, %p2783_p3 }
  0x11   :  { %2793 = shalt.err (!%p2790_p7)
}
  0x12   :  { %19 = dma.hbm_to_vmem [thread:$0]  %s4263_s0, 128, %s17_s10, [#allocation3]  }
  0x13   :  { %s2794_s25 = scalar_lea.hbm %s4264_s1, 8192 }
  0x14   :  { %p2795_p8 = scmp.ne.s32.totalorder %s4264_s1, %s2794_s25  ;;  %p2798_p9 = scmp.lt.u32.totalorder %s2794_s25, %s4264_s1 }
  0x16   :  { %p2800_p10 = pnand %p2798_p9, %p2795_p8 }
  0x18   :  { %2803 = shalt.err (!%p2800_p10)
}
  0x19   :  { %s2804_s30 = scalar_lea.vmem %s2873_s12, 8192  ;;  %p2809_p12 = scmp.lt.s32.totalorder %s2873_s12, %s2873_s12 }
  0x1a   :  { %p2805_p11 = scmp.ne.s32.totalorder %s2873_s12, %s2804_s30  ;;  %p2810_p13 = scmp.lt.s32.totalorder %s2804_s30, %s2804_s30 }
  0x1c   :  { %p2811_p0 = por %p2810_p13, %p2809_p12 }
  0x1e   :  { %p2812_p1 = pnand %p2811_p0, %p2805_p11 }
  0x20   :  { %2815 = shalt.err (!%p2812_p1)
}
  0x21   :  { %s2846_s0 = smov 128   ;;  %s2847_s3 = smov 8  }
  0x22   :  { %31 = dma.hbm_to_vmem [thread:$0]  %s4264_s1, 8192, %s2873_s12, [#allocation6], %s2846_s0, %s2846_s0, %s2847_s3  }
  0x23   :  { %2838 = dma.done.wait [#allocation3], 128  }
  0x24   :  { %2839 = vsyncadd [#allocation3], 4294967168 }
  0x25   :  { %2840 = dma.done.wait [#allocation6], 8192  }
  0x26   :  { %2841 = vsyncadd [#allocation6], 4294959104  ;;  %v2848_v0 = vmov 2   ;;  %v2849_v1 = vmov 0   ;;  %v2904_v2 = vld [vmem:[#allocation2] sm:$0xff]  ;;  %v2906_v3 = vld [vmem:[#allocation5 + $0x80] sm:$0xff] }
  0x27   :  { %2765 = vset.pattern.permute.xlu1 %v2848_v0  ;;  %2763 = vset.pattern.permute.xlu0 %v2849_v1  ;;  %v2908_v4 = vld [vmem:[#allocation5 + $0x88] sm:$0xff]  ;;  %v249_v5 = vand.u32 4294901760, %v2906_v3  ;;  %v2914_v7 = vld [vmem:[#allocation5] sm:$0xff]  ;;  %v2918_v9 = vld [vmem:[#allocation5 + $0x90] sm:$0xff]  ;;  %v2850_v24 = vmov 3   ;;  %v2851_v25 = vmov 1  }
  0x28   :  { %127 = vperm.xlu1 %2765, %v2904_v2   ;;  %109 = vperm.xlu0 %2763, %v2904_v2   ;;  %v252_v6 = vand.u32 4294901760, %v2908_v4  ;;  %v2916_v8 = vld [vmem:[#allocation5 + $0x8] sm:$0xff]  ;;  %v201_v10 = vand.u32 4294901760, %v2914_v7  ;;  %v2922_v12 = vld [vmem:[#allocation5 + $0x98] sm:$0xff]  ;;  %v255_v13 = vand.u32 4294901760, %v2918_v9  ;;  %v2925_v14 = vld [vmem:[#allocation5 + $0x10] sm:$0xff] }
  0x29   :  { %v204_v11 = vand.u32 4294901760, %v2916_v8  ;;  %v2927_v15 = vld [vmem:[#allocation5 + $0x18] sm:$0xff]  ;;  %v2930_v16 = vsub.f32 %v2906_v3, %v249_v5  ;;  %v258_v18 = vand.u32 4294901760, %v2922_v12  ;;  %v207_v19 = vand.u32 4294901760, %v2925_v14  ;;  %v2999_v46 = vld [vmem:[#allocation5 + $0xa0] sm:$0xff]  ;;  %v3001_v47 = vld [vmem:[#allocation5 + $0xa8] sm:$0xff] }
  0x2a   :  { %v2933_v17 = vsub.f32 %v2908_v4, %v252_v6  ;;  %v2940_v20 = vsub.f32 %v2914_v7, %v201_v10  ;;  %v2950_v22 = vsub.f32 %v2918_v9, %v255_v13  ;;  %v210_v23 = vand.u32 4294901760, %v2927_v15  ;;  %v3006_v54 = vld [vmem:[#allocation5 + $0x20] sm:$0xff]  ;;  %v3008_v55 = vld [vmem:[#allocation5 + $0x28] sm:$0xff]  ;;  %v3016_v0 = vld [vmem:[#allocation5 + $0xb0] sm:$0xff]  ;;  %s2857_s1 = smov [#allocation7]  }
  0x2b   :  { %v2945_v21 = vsub.f32 %v2916_v8, %v204_v11  ;;  %v4273_v26 = vand.u32 4294901760, %v2930_v16  ;;  %v2958_v28 = vsub.f32 %v2922_v12, %v258_v18  ;;  %v2963_v29 = vsub.f32 %v2925_v14, %v207_v19  ;;  %v3018_v1 = vld [vmem:[#allocation5 + $0xb8] sm:$0xff]  ;;  %s1931_s6 = sshll.u32 %s2857_s1, 4  ;;  %s1932_s6 = int_to_ptr.vmem [resolvable:$true] %s1931_s6 }
  0x2c   :  { %2766 = vset.pattern.permute.xlu1 %v2850_v24  ;;  %2764 = vset.pattern.permute.xlu0 %v2851_v25  ;;  %v4272_v27 = vand.u32 4294901760, %v2933_v17  ;;  %v4271_v30 = vand.u32 4294901760, %v2940_v20  ;;  %v4269_v32 = vand.u32 4294901760, %v2950_v22  ;;  %v2973_v33 = vsub.f32 %v2927_v15, %v210_v23  ;;  %v3029_v24 = vld [vmem:[#allocation5 + $0x30] sm:$0xff]  ;;  %v3055_v12 = vld [vmem:[#allocation5 + $0x38] sm:$0xff]  ;;  %s2816_s7 = scalar_lea.vmem %s1932_s6, 128  ;;  %p2821_p3 = scmp.lt.s32.totalorder %s1932_s6, %s1932_s6 }
  0x2d   :  { %138 = vperm.xlu1 %2766, %v2904_v2   ;;  %116 = vperm.xlu0 %2764, %v2904_v2   ;;  %v4270_v31 = vand.u32 4294901760, %v2945_v21  ;;  %v428_v34 = vsub.f32 %v2930_v16, %v4273_v26  ;;  %v4268_v36 = vand.u32 4294901760, %v2958_v28  ;;  %v4267_v37 = vand.u32 4294901760, %v2963_v29  ;;  %v3213_v26 = vld [vmem:[#allocation5 + $0xe0] sm:$0xff]  ;;  %p2817_p2 = scmp.ne.s32.totalorder %s1932_s6, %s2816_s7  ;;  %p2822_p4 = scmp.lt.s32.totalorder %s2816_s7, %s2816_s7 }
  0x2e   :  { %v435_v35 = vsub.f32 %v2933_v17, %v4272_v27  ;;  %v316_v38 = vsub.f32 %v2940_v20, %v4271_v30  ;;  %v442_v40 = vsub.f32 %v2950_v22, %v4269_v32  ;;  %v4266_v41 = vand.u32 4294901760, %v2973_v33 }
  0x2f   :  { %v323_v39 = vsub.f32 %v2945_v21, %v4270_v31  ;;  %v429_v42 = vand.u32 4294901760, %v428_v34  ;;  %v449_v44 = vsub.f32 %v2958_v28, %v4268_v36  ;;  %v330_v45 = vsub.f32 %v2963_v29, %v4267_v37  ;;  %v3128_v36 = vld [vmem:[#allocation5 + $0xd0] sm:$0xff]  ;;  %p2823_p5 = por %p2822_p4, %p2821_p3 }
  0x30   :  { %v436_v43 = vand.u32 4294901760, %v435_v35  ;;  %v2852_v48 = vmov 4   ;;  %v2853_v49 = vmov 5   ;;  %v317_v50 = vand.u32 4294901760, %v316_v38 }
  0x31   :  { %2767 = vset.pattern.permute.xlu1 %v2852_v48  ;;  %2768 = vset.pattern.permute.xlu0 %v2853_v49  ;;  %v324_v51 = vand.u32 4294901760, %v323_v39  ;;  %v443_v52 = vand.u32 4294901760, %v442_v40  ;;  %v337_v53 = vsub.f32 %v2973_v33, %v4266_v41  ;;  %v450_v57 = vand.u32 4294901760, %v449_v44  ;;  %p2824_p6 = pnand %p2823_p5, %p2817_p2 }
  0x32   :  { %149 = vperm.xlu1 %2767, %v2904_v2   ;;  %160 = vperm.xlu0 %2768, %v2904_v2   ;;  %v2397_v56 = vpack.c.bf16 %v436_v43, %v429_v42  ;;  %v331_v58 = vand.u32 4294901760, %v330_v45  ;;  %v3012_v59 = vpack.c.bf16 %v252_v6, %v249_v5  ;;  %v261_v62 = vand.u32 4294901760, %v2999_v46 }
  0x33   :  { %v2399_v60 = vpack.c.bf16 %v324_v51, %v317_v50  ;;  %v338_v61 = vand.u32 4294901760, %v337_v53  ;;  %v264_v63 = vand.u32 4294901760, %v3001_v47  ;;  %v2401_v3 = vpack.c.bf16 %v450_v57, %v443_v52  ;;  %v3106_v57 = vld [vmem:[#allocation5 + $0xc0] sm:$0xff] }
  0x34   :  { %2398 = vmatprep.subr.bf16.mxu1 %v2397_v56  ;;  %2366 = vmatprep.subr.bf16.mxu0 %v3012_v59  ;;  %v3025_v4 = vpack.c.bf16 %v204_v11, %v201_v10  ;;  %v213_v5 = vand.u32 4294901760, %v3006_v54  ;;  %v216_v6 = vand.u32 4294901760, %v3008_v55  ;;  %v3032_v34 = vsub.f32 %v2999_v46, %v261_v62 }
  0x35   :  { %2400 = vmatpush3.bf16.msra.mxu1 %v2399_v60  ;;  %v2403_v25 = vpack.c.bf16 %v338_v61, %v331_v58  ;;  %v3035_v35 = vsub.f32 %v3001_v47, %v264_v63  ;;  %v3041_v7 = vpack.c.bf16 %v258_v18, %v255_v13  ;;  %v2854_v8 = vmov 6  }
  0x36   :  { %2769 = vset.pattern.permute.xlu1 %v2854_v8  ;;  %2402 = vmatprep.subr.bf16.mxu1 %v2401_v3  ;;  %v3046_v10 = vsub.f32 %v3006_v54, %v213_v5  ;;  %v3051_v11 = vsub.f32 %v3008_v55, %v216_v6  ;;  %v267_v38 = vand.u32 4294901760, %v3016_v0  ;;  %v270_v9 = vand.u32 4294901760, %v3018_v1 }
  0x37   :  { %171 = vperm.xlu1 %2769, %v2904_v2   ;;  %v4291_v13 = vand.u32 4294901760, %v3032_v34  ;;  %v4289_v18 = vand.u32 4294901760, %v3035_v35  ;;  %2368 = vmatpush3.bf16.msra.mxu0 %v3025_v4  ;;  %v3065_v39 = vpack.c.bf16 %v210_v23, %v207_v19  ;;  %v219_v40 = vand.u32 4294901760, %v3029_v24 }
  0x38   :  { %v4286_v42 = vand.u32 4294901760, %v3046_v10  ;;  %v4283_v43 = vand.u32 4294901760, %v3051_v11  ;;  %2370 = vmatprep.subr.bf16.mxu0 %v3041_v7  ;;  %v3074_v44 = vsub.f32 %v3016_v0, %v267_v38  ;;  %v3079_v14 = vsub.f32 %v3018_v1, %v270_v9  ;;  %v3169_v0 = vld [vmem:[#allocation5 + $0x58] sm:$0xff] }
  0x39   :  { %v2855_v15 = vmov 7   ;;  %2404 = vmatpush3.bf16.msra.mxu1 %v2403_v25  ;;  %v456_v19 = vsub.f32 %v3032_v34, %v4291_v13  ;;  %v463_v23 = vsub.f32 %v3035_v35, %v4289_v18  ;;  %v222_v45 = vand.u32 4294901760, %v3055_v12  ;;  %v3115_v25 = vld [vmem:[#allocation5 + $0xc8] sm:$0xff] }
  0x3a   :  { %2771 = vset.pattern.permute.xlu0 %v2855_v15  ;;  %v3091_v46 = vsub.f32 %v3029_v24, %v219_v40  ;;  %v344_v47 = vsub.f32 %v3046_v10, %v4286_v42  ;;  %v351_v48 = vsub.f32 %v3051_v11, %v4283_v43  ;;  %v4282_v49 = vand.u32 4294901760, %v3074_v44 }
  0x3b   :  { %v4281_v50 = vand.u32 4294901760, %v3079_v14  ;;  %2770 = vset.pattern.permute.xlu1 %v2855_v15  ;;  %v457_v51 = vand.u32 4294901760, %v456_v19  ;;  %v464_v52 = vand.u32 4294901760, %v463_v23  ;;  %2372 = vmatpush3.bf16.msra.mxu0 %v3065_v39  ;;  %v3104_v56 = vsub.f32 %v3055_v12, %v222_v45  ;;  %v3123_v19 = vld [vmem:[#allocation5 + $0x40] sm:$0xff]  ;;  %v3125_v23 = vld [vmem:[#allocation5 + $0x48] sm:$0xff] }
  0x3c   :  { %v4280_v53 = vand.u32 4294901760, %v3091_v46  ;;  %182 = vperm.xlu1 %2770, %v2904_v2   ;;  %v345_v58 = vand.u32 4294901760, %v344_v47  ;;  %v352_v60 = vand.u32 4294901760, %v351_v48  ;;  %v470_v61 = vsub.f32 %v3074_v44, %v4282_v49 }
  0x3d   :  { %v477_v3 = vsub.f32 %v3079_v14, %v4281_v50  ;;  %v2405_v8 = vpack.c.bf16 %v464_v52, %v457_v51  ;;  %v4278_v15 = vand.u32 4294901760, %v3104_v56  ;;  %v3121_v2 = vpack.c.bf16 %v264_v63, %v261_v62  ;;  %v3226_v50 = vld [vmem:[#allocation5 + $0x68] sm:$0xff] }
  0x3e   :  { %v358_v12 = vsub.f32 %v3091_v46, %v4280_v53  ;;  %v2407_v47 = vpack.c.bf16 %v352_v60, %v345_v58  ;;  %v471_v48 = vand.u32 4294901760, %v470_v61  ;;  %v273_v37 = vand.u32 4294901760, %v3106_v57  ;;  %v3141_v58 = vld [vmem:[#allocation5 + $0xd8] sm:$0xff] }
  0x3f   :  { %v478_v41 = vand.u32 4294901760, %v477_v3  ;;  %2406 = vmatprep.subr.bf16.mxu1 %v2405_v8  ;;  %v365_v52 = vsub.f32 %v3104_v56, %v4278_v15  ;;  %2374 = vmatprep.subr.bf16.mxu0 %v3121_v2  ;;  %v276_v62 = vand.u32 4294901760, %v3115_v25  ;;  %v3139_v63 = vpack.c.bf16 %v216_v6, %v213_v5  ;;  %v3222_v15 = vld [vmem:[#allocation5 + $0x60] sm:$0xff] }
  0x40   :  { %v359_v51 = vand.u32 4294901760, %v358_v12  ;;  %2408 = vmatpush3.bf16.msra.mxu1 %v2407_v47  ;;  %v3144_v61 = vsub.f32 %v3106_v57, %v273_v37  ;;  %v225_v3 = vand.u32 4294901760, %v3123_v19  ;;  %v228_v8 = vand.u32 4294901760, %v3125_v23 }
  0x41   :  { %v2409_v60 = vpack.c.bf16 %v478_v41, %v471_v48  ;;  %v366_v12 = vand.u32 4294901760, %v365_v52  ;;  %v3149_v32 = vsub.f32 %v3115_v25, %v276_v62  ;;  %2376 = vmatpush3.bf16.msra.mxu0 %v3139_v63  ;;  %v3156_v54 = vpack.c.bf16 %v270_v9, %v267_v38  ;;  %v3167_v25 = vld [vmem:[#allocation5 + $0x50] sm:$0xff] }
  0x42   :  { %v279_v41 = vand.u32 4294901760, %v3128_v36  ;;  %v4276_v55 = vand.u32 4294901760, %v3144_v61  ;;  %v3161_v5 = vsub.f32 %v3123_v19, %v225_v3  ;;  %v3164_v6 = vsub.f32 %v3125_v23, %v228_v8 }
  0x43   :  { %2410 = vmatprep.subr.bf16.mxu1 %v2409_v60  ;;  %v282_v57 = vand.u32 4294901760, %v3141_v58  ;;  %v2411_v1 = vpack.c.bf16 %v366_v12, %v359_v51  ;;  %v4275_v38 = vand.u32 4294901760, %v3149_v32  ;;  %2378 = vmatprep.subr.bf16.mxu0 %v3156_v54  ;;  %v3180_v19 = vpack.c.bf16 %v222_v45, %v219_v40 }
  0x44   :  { %v3176_v9 = vsub.f32 %v3128_v36, %v279_v41  ;;  %v484_v23 = vsub.f32 %v3144_v61, %v4276_v55  ;;  %v4274_v47 = vand.u32 4294901760, %v3161_v5  ;;  %v4277_v48 = vand.u32 4294901760, %v3164_v6 }
  0x45   :  { %4375 = vst [vmem:[#allocation11_spill] sm:$0xff] %v3180_v19  ;;  %v3188_v51 = vsub.f32 %v3141_v58, %v282_v57  ;;  %2412 = vmatpush3.bf16.msra.mxu1 %v2411_v1  ;;  %v491_v52 = vsub.f32 %v3149_v32, %v4275_v38  ;;  %2380 = vmatpush3.bf16.msra.mxu0 %v3180_v19  ;;  %v231_v40 = vand.u32 4294901760, %v3167_v25  ;;  %v234_v45 = vand.u32 4294901760, %v3169_v0 }
  0x46   :  { %v4279_v24 = vand.u32 4294901760, %v3176_v9  ;;  %v485_v60 = vand.u32 4294901760, %v484_v23  ;;  %v372_v12 = vsub.f32 %v3161_v5, %v4274_v47  ;;  %v379_v58 = vsub.f32 %v3164_v6, %v4277_v48  ;;  %v3215_v47 = vld [vmem:[#allocation5 + $0xe8] sm:$0xff] }
  0x47   :  { %v4285_v1 = vand.u32 4294901760, %v3188_v51  ;;  %v492_v31 = vand.u32 4294901760, %v491_v52  ;;  %v3208_v27 = vsub.f32 %v3167_v25, %v231_v40  ;;  %v3211_v23 = vsub.f32 %v3169_v0, %v234_v45 }
  0x48   :  { %v498_v30 = vsub.f32 %v3176_v9, %v4279_v24  ;;  %v373_v38 = vand.u32 4294901760, %v372_v12  ;;  %v380_v55 = vand.u32 4294901760, %v379_v58  ;;  %v3220_v48 = vpack.c.bf16 %v276_v62, %v273_v37 }
  0x49   :  { %v505_v52 = vsub.f32 %v3188_v51, %v4285_v1  ;;  %v2413_v24 = vpack.c.bf16 %v492_v31, %v485_v60  ;;  %v4284_v53 = vand.u32 4294901760, %v3208_v27  ;;  %v4287_v0 = vand.u32 4294901760, %v3211_v23 }
  0x4a   :  { %4376 = vst [vmem:[#allocation12_spill] sm:$0xff] %v3220_v48  ;;  %v499_v25 = vand.u32 4294901760, %v498_v30  ;;  %v2415_v49 = vpack.c.bf16 %v380_v55, %v373_v38  ;;  %2382 = vmatprep.subr.bf16.mxu0 %v3220_v48  ;;  %v285_v12 = vand.u32 4294901760, %v3213_v26  ;;  %v288_v58 = vand.u32 4294901760, %v3215_v47  ;;  %v69_v55 = vld [vmem:[#allocation5 + $0xf0] sm:$0xff] }
  0x4b   :  { %v506_v43 = vand.u32 4294901760, %v505_v52  ;;  %2414 = vmatprep.subr.bf16.mxu1 %v2413_v24  ;;  %v386_v31 = vsub.f32 %v3208_v27, %v4284_v53  ;;  %v393_v30 = vsub.f32 %v3211_v23, %v4287_v0  ;;  %v3237_v37 = vpack.c.bf16 %v228_v8, %v225_v3  ;;  %v70_v53 = vld [vmem:[#allocation5 + $0xf8] sm:$0xff] }
  0x4c   :  { %v237_v62 = vand.u32 4294901760, %v3222_v15  ;;  %2416 = vmatpush3.bf16.msra.mxu1 %v2415_v49  ;;  %v3241_v60 = vsub.f32 %v3213_v26, %v285_v12  ;;  %v3244_v24 = vsub.f32 %v3215_v47, %v288_v58  ;;  %v240_v52 = vand.u32 4294901760, %v3226_v50 }
  0x4d   :  { %4377 = vst [vmem:[#allocation13_spill] sm:$0xff] %v3237_v37  ;;  %v2417_v38 = vpack.c.bf16 %v506_v43, %v499_v25  ;;  %v387_v1 = vand.u32 4294901760, %v386_v31  ;;  %v394_v42 = vand.u32 4294901760, %v393_v30  ;;  %2384 = vmatpush3.bf16.msra.mxu0 %v3237_v37  ;;  %v3253_v49 = vpack.c.bf16 %v282_v57, %v279_v41  ;;  %v53_v25 = vld [vmem:[#allocation5 + $0x70] sm:$0xff]  ;;  %v54_v31 = vld [vmem:[#allocation5 + $0x78] sm:$0xff] }
  0x4e   :  { %v3249_v3 = vsub.f32 %v3222_v15, %v237_v62  ;;  %v4288_v26 = vand.u32 4294901760, %v3241_v60  ;;  %v4290_v43 = vand.u32 4294901760, %v3244_v24  ;;  %v3258_v8 = vsub.f32 %v3226_v50, %v240_v52 }
  0x4f   :  { %4378 = vst [vmem:[#allocation14_spill] sm:$0xff] %v3253_v49  ;;  %2418 = vmatprep.subr.bf16.mxu1 %v2417_v38  ;;  %v291_v47 = vand.u32 4294901760, %v69_v55  ;;  %v2419_v30 = vpack.c.bf16 %v394_v42, %v387_v1  ;;  %2386 = vmatprep.subr.bf16.mxu0 %v3253_v49  ;;  %v294_v15 = vand.u32 4294901760, %v70_v53  ;;  %v3262_v36 = vpack.c.bf16 %v234_v45, %v231_v40 }
  0x50   :  { %v4294_v0 = vand.u32 4294901760, %v3249_v3  ;;  %v512_v41 = vsub.f32 %v3241_v60, %v4288_v26  ;;  %v519_v50 = vsub.f32 %v3244_v24, %v4290_v43  ;;  %v4301_v57 = vand.u32 4294901760, %v3258_v8 }
  0x51   :  { %4379 = vst [vmem:[#allocation15_spill] sm:$0xff] %v3262_v36  ;;  %v3271_v38 = vsub.f32 %v69_v55, %v291_v47  ;;  %2420 = vmatpush3.bf16.msra.mxu1 %v2419_v30  ;;  %v3276_v1 = vsub.f32 %v70_v53, %v294_v15  ;;  %2388 = vmatpush3.bf16.msra.mxu0 %v3262_v36  ;;  %v243_v40 = vand.u32 4294901760, %v53_v25  ;;  %v246_v45 = vand.u32 4294901760, %v54_v31 }
  0x52   :  { %v400_v42 = vsub.f32 %v3249_v3, %v4294_v0  ;;  %v513_v26 = vand.u32 4294901760, %v512_v41  ;;  %v520_v18 = vand.u32 4294901760, %v519_v50  ;;  %v407_v43 = vsub.f32 %v3258_v8, %v4301_v57 }
  0x53   :  { %v525_v55 = vand.u32 4294901760, %v3271_v38  ;;  %v532_v30 = vand.u32 4294901760, %v3276_v1  ;;  %v3284_v49 = vsub.f32 %v53_v25, %v243_v40  ;;  %v3286_v0 = vsub.f32 %v54_v31, %v246_v45 }
  0x54   :  { %v401_v13 = vand.u32 4294901760, %v400_v42  ;;  %v2421_v53 = vpack.c.bf16 %v520_v18, %v513_v26  ;;  %v408_v37 = vand.u32 4294901760, %v407_v43  ;;  %v3289_v48 = vpack.c.bf16 %v288_v58, %v285_v12 }
  0x55   :  { %v526_v36 = vsub.f32 %v3271_v38, %v525_v55  ;;  %v533_v41 = vsub.f32 %v3276_v1, %v532_v30  ;;  %v413_v50 = vand.u32 4294901760, %v3284_v49  ;;  %v420_v57 = vand.u32 4294901760, %v3286_v0 }
  0x56   :  { %2422 = vmatprep.subr.bf16.mxu1 %v2421_v53  ;;  %v2423_v42 = vpack.c.bf16 %v408_v37, %v401_v13  ;;  %2390 = vmatprep.subr.bf16.mxu0 %v3289_v48  ;;  %v3295_v25 = vpack.c.bf16 %v240_v52, %v237_v62  ;;  %v3297_v31 = vpack.c.bf16 %v294_v15, %v291_v47  ;;  %v4388_v53 = vand.u32 4294901760, %v3104_v56 }
  0x57   :  { %v527_v19 = vand.u32 4294901760, %v526_v36  ;;  %v534_v18 = vand.u32 4294901760, %v533_v41  ;;  %v414_v26 = vsub.f32 %v3284_v49, %v413_v50  ;;  %v421_v12 = vsub.f32 %v3286_v0, %v420_v57 }
  0x58   :  { %v3301_v58 = vpack.c.bf16 %v246_v45, %v243_v40  ;;  %2424 = vmatpush3.bf16.msra.mxu1 %v2423_v42  ;;  %2392 = vmatpush3.bf16.msra.mxu0 %v3295_v25  ;;  %v2429_v13 = vpack.c.bf16 %v2933_v17, %v2930_v16  ;;  %v4383_v42 = vand.u32 4294901760, %v3051_v11  ;;  %v4385_v41 = vand.u32 4294901760, %v3079_v14 }
  0x59   :  { %v2425_v52 = vpack.c.bf16 %v534_v18, %v527_v19  ;;  %v415_v43 = vand.u32 4294901760, %v414_v26  ;;  %v422_v47 = vand.u32 4294901760, %v421_v12  ;;  %2394 = vmatprep.subr.bf16.mxu0 %v3297_v31  ;;  %v4382_v26 = vand.u32 4294901760, %v3046_v10 }
  0x5b   :  { %2426 = vmatprep.subr.bf16.mxu1 %v2425_v52  ;;  %v2427_v19 = vpack.c.bf16 %v422_v47, %v415_v43  ;;  %v4380_v47 = vand.u32 4294901760, %v3032_v34  ;;  %v3349_v12 = vpack.c.bf16 %v4383_v42, %v4382_v26  ;;  %v4387_v43 = vand.u32 4294901760, %v3091_v46 }
  0x5c   :  { %2396 = vmatpush3.bf16.msra.mxu0 %v3301_v58  ;;  %v4393_v42 = vand.u32 4294901760, %v3161_v5  ;;  %v4394_v26 = vand.u32 4294901760, %v3164_v6 }
  0x5d   :  { %2428 = vmatpush3.bf16.msra.mxu1 %v2427_v19  ;;  %2430 = vmatprep.subr.bf16.mxu0 %v2429_v13  ;;  %v4381_v19 = vand.u32 4294901760, %v3035_v35  ;;  %v4384_v13 = vand.u32 4294901760, %v3074_v44  ;;  %v3361_v45 = vpack.c.bf16 %v4388_v53, %v4387_v43  ;;  %v4399_v53 = vand.u32 4294901760, %v3208_v27 }
  0x5e   :  { %2462 = vmatprep.subr.bf16.mxu1 %v3012_v59  ;;  %v3373_v36 = vpack.c.bf16 %v4394_v26, %v4393_v42  ;;  %v4400_v43 = vand.u32 4294901760, %v3211_v23  ;;  %v4405_v42 = vand.u32 4294901760, %v3249_v3  ;;  %v4406_v26 = vand.u32 4294901760, %v3258_v8 }
  0x5f   :  { %v3343_v18 = vpack.c.bf16 %v4381_v19, %v4380_v47  ;;  %v3355_v52 = vpack.c.bf16 %v4385_v41, %v4384_v13  ;;  %4389 = vst [vmem:[#allocation17_spill] sm:$0xff] %v3361_v45  ;;  %v4390_v47 = vand.u32 4294901760, %v3144_v61  ;;  %v4391_v19 = vand.u32 4294901760, %v3149_v32  ;;  %v3518_v45 = vld [vmem:[#allocation5 + $0x158] sm:$0xff] }
  0x60   :  { %4395 = vst [vmem:[#allocation19_spill] sm:$0xff] %v3373_v36  ;;  %v4396_v41 = vand.u32 4294901760, %v3176_v9  ;;  %v4397_v13 = vand.u32 4294901760, %v3188_v51  ;;  %v3385_v62 = vpack.c.bf16 %v4400_v43, %v4399_v53  ;;  %v3397_v36 = vpack.c.bf16 %v4406_v26, %v4405_v42 }
  0x61   :  { %4386 = vst [vmem:[#allocation16_spill] sm:$0xff] %v3355_v52  ;;  %v3367_v40 = vpack.c.bf16 %v4391_v19, %v4390_v47  ;;  %v4402_v47 = vand.u32 4294901760, %v3241_v60  ;;  %v4403_v19 = vand.u32 4294901760, %v3244_v24  ;;  %v2856_v26 = vmov 0.0   ;;  %v3538_v52 = vld [vmem:[#allocation5 + $0x1e0] sm:$0xff] }
  0x62   :  { %v3379_v15 = vpack.c.bf16 %v4397_v13, %v4396_v41  ;;  %4401 = vst [vmem:[#allocation21_spill] sm:$0xff] %v3385_v62  ;;  %4407 = vst [vmem:[#allocation23_spill] sm:$0xff] %v3397_v36  ;;  %v3399_v41 = vpack.c.bf16 %v532_v30, %v525_v55  ;;  %v3401_v13 = vpack.c.bf16 %v420_v57, %v413_v50  ;;  %v3556_v36 = vld [vmem:[#allocation5 + $0x160] sm:$0xff] }
  0x63   :  { %4392 = vst [vmem:[#allocation18_spill] sm:$0xff] %v3367_v40  ;;  %v3391_v37 = vpack.c.bf16 %v4403_v19, %v4402_v47 }
  0x64   :  { %4398 = vst [vmem:[#allocation20_spill] sm:$0xff] %v3379_v15  ;;  %4408 = vst [vmem:[#allocation24_spill] sm:$0xff] %v3399_v41  ;;  %v103_v15 = vlaneseq  ;;  %v4428_v41 = vld [vmem:[#allocation11_spill] sm:$0xff] }
  0x65   :  { %4404 = vst [vmem:[#allocation22_spill] sm:$0xff] %v3391_v37  ;;  %4409 = vst [vmem:[#allocation25_spill] sm:$0xff] %v3401_v13 }
  0x66   :  { %v3403_v40 = vand.u32 127, %v103_v15  ;;  %v3471_v15 = vld [vmem:[#allocation5 + $0x130] sm:$0xff] }
  0x67   :  { %4417 = vst [vmem:[#allocation29_spill] sm:$0xff] %v3471_v15  ;;  %v4309_v13 = vand.u32 4294901760, %v3471_v15 }
  0x68   :  { %v105_v62 = vadd.s32 128, %v3403_v40  ;;  %v3407_v47 = vadd.s32 256, %v3403_v40  ;;  %v3411_v42 = vadd.s32 384, %v3403_v40 }
  0xa7   :  { %v128_v53 = vpop.permute.xlu1 %127  ;;  %v110_v43 = vpop.permute.xlu0 %109 }
  0xa8   :  { %vm111_vm0 = vcmp.eq.s32.totalorder %v3403_v40, %v110_v43  ;;  %vm112_vm1 = vcmp.eq.s32.totalorder %v105_v62, %v110_v43  ;;  %vm113_vm2 = vcmp.eq.s32.totalorder %v3407_v47, %v110_v43  ;;  %vm114_vm6 = vcmp.eq.s32.totalorder %v3411_v42, %v110_v43 }
  0xa9   :  { %vm129_vm11 = vcmp.eq.s32.totalorder %v3403_v40, %v128_v53  ;;  %vm130_vm13 = vcmp.eq.s32.totalorder %v105_v62, %v128_v53  ;;  %vm131_vm15 = vcmp.eq.s32.totalorder %v3407_v47, %v128_v53 }
  0xac   :  { %v139_v19 = vpop.permute.xlu1 %138  ;;  %v117_v37 = vpop.permute.xlu0 %116 }
  0xad   :  { %vm118_vm3 = vcmp.eq.s32.totalorder %v3403_v40, %v117_v37  ;;  %vm119_vm4 = vcmp.eq.s32.totalorder %v105_v62, %v117_v37  ;;  %vm120_vm5 = vcmp.eq.s32.totalorder %v3407_v47, %v117_v37  ;;  %vm121_vm7 = vcmp.eq.s32.totalorder %v3411_v42, %v117_v37  ;;  %v3473_v37 = vld [vmem:[#allocation5 + $0x138] sm:$0xff] }
  0xae   :  { %vm122_vm8 = vmor %vm111_vm0, %vm118_vm3  ;;  %vm132_vm3 = vcmp.eq.s32.totalorder %v3411_v42, %v128_v53  ;;  %4418 = vst [vmem:[#allocation30_spill] sm:$0xff] %v3473_v37 }
  0xaf   :  { %vm123_vm9 = vmor %vm112_vm1, %vm119_vm4  ;;  %vm140_vm4 = vcmp.eq.s32.totalorder %v3403_v40, %v139_v19 }
  0xb0   :  { %vm124_vm10 = vmor %vm113_vm2, %vm120_vm5  ;;  %vm141_vm5 = vcmp.eq.s32.totalorder %v105_v62, %v139_v19 }
  0xb1   :  { %vm125_vm12 = vmor %vm114_vm6, %vm121_vm7  ;;  %v150_v57 = vpop.permute.xlu1 %149  ;;  %vm142_vm7 = vcmp.eq.s32.totalorder %v3407_v47, %v139_v19  ;;  %v161_v30 = vpop.permute.xlu0 %160 }
  0xb2   :  { %vm133_vm14 = vmor %vm122_vm8, %vm129_vm11  ;;  %vm151_vm8 = vcmp.eq.s32.totalorder %v3403_v40, %v150_v57 }
  0xb3   :  { %vm134_vm0 = vmor %vm123_vm9, %vm130_vm13  ;;  %vm143_vm9 = vcmp.eq.s32.totalorder %v3411_v42, %v139_v19  ;;  %vm152_vm13 = vcmp.eq.s32.totalorder %v105_v62, %v150_v57 }
  0xb4   :  { %vm135_vm1 = vmor %vm124_vm10, %vm131_vm15  ;;  %vm153_vm15 = vcmp.eq.s32.totalorder %v3407_v47, %v150_v57 }
  0xb5   :  { %vm136_vm2 = vmor %vm125_vm12, %vm132_vm3  ;;  %vm154_vm12 = vcmp.eq.s32.totalorder %v3411_v42, %v150_v57 }
  0xb6   :  { %vm144_vm6 = vmor %vm133_vm14, %vm140_vm4  ;;  %v172_v55 = vpop.permute.xlu1 %171 }
  0xb7   :  { %vm145_vm11 = vmor %vm134_vm0, %vm141_vm5  ;;  %vm162_vm0 = vcmp.eq.s32.totalorder %v3403_v40, %v161_v30 }
  0xb8   :  { %vm146_vm10 = vmor %vm135_vm1, %vm142_vm7  ;;  %vm163_vm1 = vcmp.eq.s32.totalorder %v105_v62, %v161_v30 }
  0xb9   :  { %vm147_vm3 = vmor %vm136_vm2, %vm143_vm9  ;;  %vm164_vm2 = vcmp.eq.s32.totalorder %v3407_v47, %v161_v30  ;;  %vm165_vm9 = vcmp.eq.s32.totalorder %v3411_v42, %v161_v30 }
  0xba   :  { %vm155_vm4 = vmor %vm144_vm6, %vm151_vm8 }
  0xbb   :  { %vm156_vm14 = vmor %vm145_vm11, %vm152_vm13  ;;  %v183_v50 = vpop.permute.xlu1 %182  ;;  %vm174_vm11 = vcmp.eq.s32.totalorder %v105_v62, %v172_v55 }
  0xbc   :  { %vm157_vm5 = vmor %vm146_vm10, %vm153_vm15  ;;  %vm185_vm10 = vcmp.eq.s32.totalorder %v105_v62, %v183_v50 }
  0xbd   :  { %vm158_vm7 = vmor %vm147_vm3, %vm154_vm12  ;;  %vm173_vm3 = vcmp.eq.s32.totalorder %v3403_v40, %v172_v55  ;;  %vm184_vm12 = vcmp.eq.s32.totalorder %v3403_v40, %v183_v50 }
  0xbe   :  { %vm166_vm6 = vmor %vm155_vm4, %vm162_vm0  ;;  %vm176_vm4 = vcmp.eq.s32.totalorder %v3411_v42, %v172_v55 }
  0xbf   :  { %vm167_vm8 = vmor %vm156_vm14, %vm163_vm1  ;;  %vm187_vm14 = vcmp.eq.s32.totalorder %v3411_v42, %v183_v50 }
  0xc0   :  { %vm3430_vm13 = vmor %vm157_vm5, %vm164_vm2  ;;  %vm175_vm2 = vcmp.eq.s32.totalorder %v3407_v47, %v172_v55 }
  0xc1   :  { %vm3434_vm15 = vmor %vm158_vm7, %vm165_vm9  ;;  %vm186_vm9 = vcmp.eq.s32.totalorder %v3407_v47, %v183_v50 }
  0xc2   :  { %vm178_vm0 = vmor %vm167_vm8, %vm174_vm11 }
  0xc3   :  { %vm189_vm1 = vmor %vm178_vm0, %vm185_vm10 }
  0xc4   :  { %v3442_v53 = vsel %vm189_vm1, 1.0, %v2856_v26  ;;  %vm177_vm5 = vmor %vm166_vm6, %vm173_vm3 }
  0xc5   :  { %v297_v62 = vsub.f32 %v3442_v53, %v3442_v53  ;;  %537 = vmatprep.mubr.f32.mxu1 %v3442_v53  ;;  %vm188_vm7 = vmor %vm177_vm5, %vm184_vm12 }
  0xc6   :  { %v3449_v40 = vsel %vm188_vm7, 1.0, %v2856_v26  ;;  %vm180_vm8 = vmor %vm3434_vm15, %vm176_vm4 }
  0xc7   :  { %4414 = vst [vmem:[#allocation26_spill] sm:$0xff] %v3449_v40  ;;  %v3455_v43 = vsub.f32 %v3449_v40, %v3449_v40  ;;  %539 = vmatmul.mubr.f32.vlgmr.msra.gmra.mrb[0].mxu1 %v3449_v40  ;;  %v298_v19 = vand.u32 4294901760, %v297_v62  ;;  %vm191_vm6 = vmor %vm180_vm8, %vm187_vm14  ;;  %v4433_v40 = vpack.c.bf16 %v3051_v11, %v3046_v10  ;;  %v3540_v10 = vld [vmem:[#allocation5 + $0x1e8] sm:$0xff]  ;;  %v4437_v11 = vpack.c.bf16 %v3079_v14, %v3074_v44 }
  0xc8   :  { %2464 = vmatpush3.bf16.msra.mxu1 %v3025_v4  ;;  %v3459_v42 = vsel %vm191_vm6, 1.0, %v2856_v26  ;;  %vm179_vm11 = vmor %vm3430_vm13, %vm175_vm2  ;;  %v4449_v14 = vand.u32 4294901760, %v3518_v45 }
  0xc9   :  { %4415 = vst [vmem:[#allocation27_spill] sm:$0xff] %v3459_v42  ;;  %2466 = vmatprep.subr.bf16.mxu1 %v3041_v7  ;;  %781 = vmatprep.mubr.f32.mxu1 %v298_v19  ;;  %v299_v47 = vsub.f32 %v297_v62, %v298_v19  ;;  %v4304_v57 = vand.u32 4294901760, %v3455_v43  ;;  %vm190_vm10 = vmor %vm179_vm11, %vm186_vm9  ;;  %v4429_v42 = vpack.c.bf16 %v3035_v35, %v3032_v34  ;;  %v4434_v34 = vld [vmem:[#allocation13_spill] sm:$0xff] }
  0xca   :  { %v3465_v55 = vsel %vm190_vm10, 1.0, %v2856_v26  ;;  %v4311_v26 = vand.u32 4294901760, %v3473_v37 }
  0xcb   :  { %4416 = vst [vmem:[#allocation28_spill] sm:$0xff] %v3465_v55  ;;  %v300_v30 = vand.u32 4294901760, %v299_v47  ;;  %v305_v50 = vsub.f32 %v3455_v43, %v4304_v57  ;;  %v4419_v47 = vpack.c.bf16 %v2945_v21, %v2940_v20  ;;  %v4420_v57 = vpack.c.bf16 %v2958_v28, %v2950_v22  ;;  %v3487_v55 = vld [vmem:[#allocation5 + $0x148] sm:$0xff] }
  0xcc   :  { %2468 = vmatpush3.bf16.msra.mxu1 %v3065_v39  ;;  %4422 = vst [vmem:[#allocation32_spill] sm:$0xff] %v3487_v55 }
  0xcd   :  { %301 = vmatprep.mubr.f32.mxu0 %v300_v30  ;;  %2470 = vmatprep.subr.bf16.mxu1 %v3121_v2  ;;  %v306_v19 = vand.u32 4294901760, %v305_v50  ;;  %v3485_v30 = vld [vmem:[#allocation5 + $0x140] sm:$0xff]  ;;  %v3490_v50 = vld [vmem:[#allocation5 + $0x1d0] sm:$0xff] }
  0xce   :  { %4421 = vst [vmem:[#allocation31_spill] sm:$0xff] %v3485_v30  ;;  %4423 = vst [vmem:[#allocation33_spill] sm:$0xff] %v3490_v50  ;;  %v4435_v35 = vand.u32 4294901760, %v3485_v30 }
  0xcf   :  { %307 = vmatmul.mubr.f32.vlgmr.msra.gmra.mrb[0].mxu0 %v306_v19  ;;  %v3492_v19 = vld [vmem:[#allocation5 + $0x1d8] sm:$0xff] }
  0xd0   :  { %2432 = vmatpush3.bf16.msra.mxu0 %v4419_v47  ;;  %2472 = vmatpush3.bf16.msra.mxu1 %v3139_v63  ;;  %4424 = vst [vmem:[#allocation34_spill] sm:$0xff] %v3492_v19  ;;  %v3497_v47 = vsub.f32 %v3471_v15, %v4309_v13  ;;  %v4430_v13 = vld [vmem:[#allocation12_spill] sm:$0xff] }
  0xd1   :  { %674 = vmatprep.mubr.f32.mxu0 %v297_v62  ;;  %2434 = vmatprep.subr.bf16.mxu0 %v4420_v57  ;;  %v3502_v62 = vsub.f32 %v3473_v37, %v4311_v26  ;;  %v4427_v57 = vpack.c.bf16 %v2973_v33, %v2963_v29  ;;  %v3516_v37 = vld [vmem:[#allocation5 + $0x150] sm:$0xff]  ;;  %4432 = vst [vmem:[#allocation12_spill] sm:$0xff] %v3518_v45  ;;  %v4436_v26 = vand.u32 4294901760, %v3487_v55 }
  0xd2   :  { %2474 = vmatprep.subr.bf16.mxu1 %v3156_v54  ;;  %4425 = vst [vmem:[#allocation35_spill] sm:$0xff] %v3497_v47  ;;  %4431 = vst [vmem:[#allocation11_spill] sm:$0xff] %v3516_v37 }
  0xd3   :  { %4426 = vst [vmem:[#allocation36_spill] sm:$0xff] %v3502_v62  ;;  %v3534_v15 = vsub.f32 %v3487_v55, %v4436_v26  ;;  %v4440_v26 = vand.u32 4294901760, %v3492_v19  ;;  %v4441_v55 = vand.u32 4294901760, %v3497_v47  ;;  %v3588_v47 = vld [vmem:[#allocation5 + $0x170] sm:$0xff] }
  0xd4   :  { %2436 = vmatpush3.bf16.msra.mxu0 %v4427_v57  ;;  %2476 = vmatpush3.bf16.msra.mxu1 %v4428_v41  ;;  %4450 = vst [vmem:[#allocation40_spill] sm:$0xff] %v3588_v47 }
  0xd5   :  { %2438 = vmatprep.subr.bf16.mxu0 %v4429_v42  ;;  %2478 = vmatprep.subr.bf16.mxu1 %v4430_v13  ;;  %v3529_v42 = vsub.f32 %v3485_v30, %v4435_v35  ;;  %v4439_v35 = vand.u32 4294901760, %v3490_v50  ;;  %v3554_v57 = vsub.f32 %v3492_v19, %v4440_v26  ;;  %v4446_v26 = vpack.c.bf16 %v3104_v56, %v3091_v46  ;;  %v4447_v19 = vld [vmem:[#allocation15_spill] sm:$0xff]  ;;  %v3590_v46 = vld [vmem:[#allocation5 + $0x178] sm:$0xff] }
  0xd6   :  { %4451 = vst [vmem:[#allocation41_spill] sm:$0xff] %v3590_v46  ;;  %v4452_v56 = vpack.c.bf16 %v3149_v32, %v3144_v61  ;;  %v4456_v61 = vand.u32 4294901760, %v3538_v52 }
  0xd7   :  { %v3549_v30 = vsub.f32 %v3490_v50, %v4439_v35  ;;  %v3568_v35 = vld [vmem:[#allocation5 + $0x1f0] sm:$0xff]  ;;  %v3570_v50 = vld [vmem:[#allocation5 + $0x1f8] sm:$0xff] }
  0xd8   :  { %2440 = vmatpush3.bf16.msra.mxu0 %v4433_v40  ;;  %2480 = vmatpush3.bf16.msra.mxu1 %v4434_v34  ;;  %v4438_v40 = vld [vmem:[#allocation14_spill] sm:$0xff]  ;;  %v4442_v34 = vand.u32 4294901760, %v3502_v62  ;;  %4444 = vst [vmem:[#allocation38_spill] sm:$0xff] %v3568_v35  ;;  %4445 = vst [vmem:[#allocation39_spill] sm:$0xff] %v3570_v50  ;;  %v4458_v62 = vpack.c.bf16 %v3164_v6, %v3161_v5  ;;  %v4461_v6 = vand.u32 4294901760, %v3554_v57 }
  0xd9   :  { %2442 = vmatprep.subr.bf16.mxu0 %v4437_v11  ;;  %2482 = vmatprep.subr.bf16.mxu1 %v4438_v40  ;;  %v3566_v40 = vld [vmem:[#allocation5 + $0x168] sm:$0xff]  ;;  %v4460_v5 = vand.u32 4294901760, %v3549_v30 }
  0xda   :  { %v3562_v44 = vpack.c.bf16 %v4442_v34, %v4441_v55  ;;  %v4448_v34 = vand.u32 4294901760, %v3516_v37  ;;  %v4323_v55 = vand.u32 4294901760, %v3556_v36 }
  0xdc   :  { %4443 = vst [vmem:[#allocation37_spill] sm:$0xff] %v3562_v44  ;;  %2444 = vmatpush3.bf16.msra.mxu0 %v4446_v26  ;;  %2484 = vmatpush3.bf16.msra.mxu1 %v4447_v19  ;;  %v3581_v11 = vsub.f32 %v3516_v37, %v4448_v34  ;;  %v3586_v44 = vsub.f32 %v3518_v45, %v4449_v14  ;;  %v4453_v37 = vand.u32 4294901760, %v3529_v42  ;;  %v4454_v19 = vand.u32 4294901760, %v3534_v15 }
  0xdd   :  { %2446 = vmatprep.subr.bf16.mxu0 %v4452_v56  ;;  %2486 = vmatprep.subr.bf16.mxu1 %v3289_v48  ;;  %v3611_v56 = vsub.f32 %v3538_v52, %v4456_v61  ;;  %v4457_v34 = vand.u32 4294901760, %v3540_v10  ;;  %v4459_v61 = vpack.c.bf16 %v3188_v51, %v3176_v9  ;;  %v4463_v45 = vand.u32 4294901760, %v3566_v40 }
  0xde   :  { %v3606_v32 = vpack.c.bf16 %v4454_v19, %v4453_v37  ;;  %v4326_v37 = vand.u32 4294901760, %v3581_v11  ;;  %v4325_v19 = vand.u32 4294901760, %v3586_v44  ;;  %v4464_v9 = vand.u32 4294901760, %v3568_v35 }
  0xdf   :  { %v3616_v26 = vsub.f32 %v3540_v10, %v4457_v34  ;;  %v3633_v34 = vsub.f32 %v3556_v36, %v4323_v55  ;;  %v3644_v14 = vsub.f32 %v3566_v40, %v4463_v45 }
  0xe0   :  { %4455 = vst [vmem:[#allocation42_spill] sm:$0xff] %v3606_v32  ;;  %2448 = vmatpush3.bf16.msra.mxu0 %v4458_v62  ;;  %2488 = vmatpush3.bf16.msra.mxu1 %v3295_v25  ;;  %v3639_v62 = vpack.c.bf16 %v4461_v6, %v4460_v5  ;;  %v3649_v51 = vsub.f32 %v3568_v35, %v4464_v9  ;;  %v4328_v6 = vand.u32 4294901760, %v3611_v56  ;;  %v4468_v32 = vand.u32 4294901760, %v3590_v46 }
  0xe1   :  { %2450 = vmatprep.subr.bf16.mxu0 %v4459_v61  ;;  %2490 = vmatprep.subr.bf16.mxu1 %v3297_v31  ;;  %v4465_v61 = vand.u32 4294901760, %v3570_v50  ;;  %v3660_v5 = vpack.c.bf16 %v4325_v19, %v4326_v37  ;;  %v4327_v45 = vand.u32 4294901760, %v3616_v26  ;;  %v4470_v19 = vpack.c.bf16 %v3244_v24, %v3241_v60 }
  0xe2   :  { %4462 = vst [vmem:[#allocation43_spill] sm:$0xff] %v3639_v62  ;;  %v4467_v62 = vand.u32 4294901760, %v3588_v47  ;;  %v4329_v37 = vand.u32 4294901760, %v3644_v14  ;;  %v4473_v24 = vpack.c.bf16 %v3258_v8, %v3249_v3  ;;  %v4477_v3 = vand.u32 4294901760, %v2930_v16 }
  0xe3   :  { %v3654_v55 = vsub.f32 %v3570_v50, %v4465_v61  ;;  %4466 = vst [vmem:[#allocation44_spill] sm:$0xff] %v3660_v5  ;;  %v3672_v61 = vsub.f32 %v3590_v46, %v4468_v32  ;;  %v4469_v50 = vpack.c.bf16 %v3211_v23, %v3208_v27  ;;  %v4332_v32 = vand.u32 4294901760, %v3633_v34 }
  0xe4   :  { %v3667_v9 = vsub.f32 %v3588_v47, %v4467_v62  ;;  %2492 = vmatpush3.bf16.msra.mxu1 %v3301_v58  ;;  %v3686_v62 = vpack.c.bf16 %v4327_v45, %v4328_v6  ;;  %v4331_v27 = vand.u32 4294901760, %v3649_v51  ;;  %v3702_v45 = vld [vmem:[#allocation5 + $0x188] sm:$0xff]  ;;  %v4478_v8 = vand.u32 4294901760, %v2933_v17 }
  0xe5   :  { %2452 = vmatpush3.bf16.msra.mxu0 %v4469_v50  ;;  %2526 = vmatprep.subr.bf16.mxu1 %v3012_v59  ;;  %v4330_v23 = vand.u32 4294901760, %v3654_v55  ;;  %v4472_v50 = vand.u32 4294901760, %v3455_v43  ;;  %v4333_v59 = vand.u32 4294901760, %v3672_v61  ;;  %v3708_v6 = vpack.c.bf16 %v4329_v37, %v4332_v32  ;;  %v3733_v32 = vld [vmem:[#allocation5 + $0x100] sm:$0xff] }
  0xe6   :  { %2454 = vmatprep.subr.bf16.mxu0 %v4470_v19  ;;  %4471 = vst [vmem:[#allocation45_spill] sm:$0xff] %v3686_v62  ;;  %v4334_v60 = vand.u32 4294901760, %v3667_v9  ;;  %v3700_v19 = vld [vmem:[#allocation5 + $0x180] sm:$0xff]  ;;  %v4480_v16 = vpack.c.bf16 %v3286_v0, %v3284_v49  ;;  %v4481_v17 = vand.u32 4294901760, %v2940_v20  ;;  %v4338_v49 = vand.u32 4294901760, %v3733_v32 }
  0xe7   :  { %785 = vmatmul.mubr.f32.vlgmr.msra.gmra.mrb[2].mxu1 %v4472_v50  ;;  %4474 = vst [vmem:[#allocation46_spill] sm:$0xff] %v3708_v6  ;;  %v3714_v50 = vpack.c.bf16 %v4330_v23, %v4331_v27  ;;  %v4342_v23 = vand.u32 4294901760, %v3700_v19  ;;  %v4339_v27 = vand.u32 4294901760, %v3702_v45  ;;  %v3868_v62 = vld [vmem:[#allocation5 + $0x1c0] sm:$0xff] }
  0xe8   :  { %2528 = vmatpush3.bf16.msra.mxu1 %v3025_v4  ;;  %1055 = vmatprep.mubr.f32.mxu1 %v3442_v53  ;;  %v4476_v4 = vpack.c.bf16 %v3276_v1, %v3271_v38  ;;  %v3728_v37 = vpack.c.bf16 %v4333_v59, %v4334_v60  ;;  %v4482_v38 = vand.u32 4294901760, %v2945_v21  ;;  %v3812_v60 = vld [vmem:[#allocation5 + $0x120] sm:$0xff] }
  0xe9   :  { %2456 = vmatpush3.bf16.msra.mxu0 %v4473_v24  ;;  %4475 = vst [vmem:[#allocation47_spill] sm:$0xff] %v3714_v50  ;;  %v2493_v24 = vpack.c.bf16 %v4478_v8, %v4477_v3  ;;  %2530 = vmatprep.subr.bf16.mxu1 %v3041_v7  ;;  %v3745_v7 = vld [vmem:[#allocation5 + $0x190] sm:$0xff]  ;;  %v4483_v3 = vand.u32 4294901760, %v2950_v22  ;;  %v4484_v8 = vand.u32 4294901760, %v2958_v28  ;;  %v3759_v20 = vsub.f32 %v3700_v19, %v4342_v23 }
  0xea   :  { %2458 = vmatprep.subr.bf16.mxu0 %v4476_v4  ;;  %4479 = vst [vmem:[#allocation48_spill] sm:$0xff] %v3728_v37  ;;  %v2495_v1 = vpack.c.bf16 %v4482_v38, %v4481_v17  ;;  %v3743_v4 = vld [vmem:[#allocation5 + $0x108] sm:$0xff]  ;;  %v3764_v21 = vsub.f32 %v3702_v45, %v4339_v27  ;;  %v4335_v28 = vand.u32 4294901760, %v3745_v7  ;;  %v3775_v17 = vld [vmem:[#allocation5 + $0x110] sm:$0xff]  ;;  %v3777_v38 = vld [vmem:[#allocation5 + $0x118] sm:$0xff] }
  0xeb   :  { %v2497_v0 = vpack.c.bf16 %v4484_v8, %v4483_v3  ;;  %4485 = vst [vmem:[#allocation49_spill] sm:$0xff] %v3759_v20  ;;  %v4337_v22 = vand.u32 4294901760, %v3743_v4  ;;  %v4343_v8 = vand.u32 4294901760, %v3775_v17  ;;  %v3828_v27 = vld [vmem:[#allocation5 + $0x1b8] sm:$0xff] }
  0xec   :  { %2532 = vmatpush3.bf16.msra.mxu1 %v3065_v39  ;;  %v3753_v39 = vld [vmem:[#allocation5 + $0x198] sm:$0xff]  ;;  %4486 = vst [vmem:[#allocation50_spill] sm:$0xff] %v3764_v21 }
  0xed   :  { %2460 = vmatpush3.bf16.msra.mxu0 %v4480_v16  ;;  %2534 = vmatprep.subr.bf16.mxu1 %v3121_v2  ;;  %v4487_v2 = vand.u32 4294901760, %v2963_v29  ;;  %v4336_v16 = vand.u32 4294901760, %v3753_v39  ;;  %v3785_v29 = vld [vmem:[#allocation5 + $0x1a0] sm:$0xff]  ;;  %v3794_v3 = vsub.f32 %v3743_v4, %v4337_v22  ;;  %v4495_v22 = vld [vmem:[#allocation13_spill] sm:$0xff] }
  0xee   :  { %2494 = vmatprep.subr.bf16.mxu0 %v2493_v24 }
  0xef   :  { %4490 = vst [vmem:[#allocation52_spill] sm:$0xff] %v3794_v3 }
  0xf0   :  { %677 = vmatmul.mubr.f32.vlgmr.msra.gmra.mrb[2].mxu0 %v3455_v43  ;;  %v4488_v43 = vand.u32 4294901760, %v2973_v33  ;;  %2536 = vmatpush3.bf16.msra.mxu1 %v3139_v63  ;;  %v3787_v33 = vld [vmem:[#allocation5 + $0x1a8] sm:$0xff]  ;;  %v4340_v63 = vand.u32 4294901760, %v3759_v20 }
  0xf1   :  { %2496 = vmatpush3.bf16.msra.mxu0 %v2495_v1  ;;  %951 = vmatprep.mubr.f32.mxu0 %v3442_v53  ;;  %v3783_v53 = vsub.f32 %v3733_v32, %v4338_v49  ;;  %v4341_v1 = vand.u32 4294901760, %v3764_v21  ;;  %v4346_v59 = vand.u32 4294901760, %v3787_v33  ;;  %v4496_v49 = vld [vmem:[#allocation16_spill] sm:$0xff] }
  0xf2   :  { %v2499_v24 = vpack.c.bf16 %v4488_v43, %v4487_v2  ;;  %2498 = vmatprep.subr.bf16.mxu0 %v2497_v0  ;;  %2538 = vmatprep.subr.bf16.mxu1 %v3156_v54  ;;  %v3799_v54 = vsub.f32 %v3745_v7, %v4335_v28  ;;  %v4344_v0 = vand.u32 4294901760, %v3777_v38  ;;  %v3808_v2 = vsub.f32 %v3753_v39, %v4336_v16  ;;  %v4499_v28 = vld [vmem:[#allocation14_spill] sm:$0xff] }
  0xf3   :  { %4489 = vst [vmem:[#allocation51_spill] sm:$0xff] %v3783_v53  ;;  %v4345_v43 = vand.u32 4294901760, %v3785_v29  ;;  %v1297_v16 = vsub.f32 %v3764_v21, %v4341_v1  ;;  %v3870_v1 = vld [vmem:[#allocation5 + $0x1c8] sm:$0xff] }
  0xf4   :  { %4491 = vst [vmem:[#allocation53_spill] sm:$0xff] %v3799_v54  ;;  %2540 = vmatpush3.bf16.msra.mxu1 %v4428_v41  ;;  %4492 = vst [vmem:[#allocation54_spill] sm:$0xff] %v3808_v2  ;;  %v3818_v41 = vld [vmem:[#allocation5 + $0x1b0] sm:$0xff]  ;;  %v4502_v6 = vand.u32 4294901760, %v3799_v54 }
  0xf5   :  { %2500 = vmatpush3.bf16.msra.mxu0 %v2499_v24  ;;  %v3814_v24 = vld [vmem:[#allocation5 + $0x128] sm:$0xff]  ;;  %2542 = vmatprep.subr.bf16.mxu1 %v4430_v13  ;;  %v3834_v13 = vsub.f32 %v3775_v17, %v4343_v8  ;;  %v3849_v8 = vsub.f32 %v3785_v29, %v4345_v43  ;;  %v1298_v37 = vand.u32 4294901760, %v1297_v16  ;;  %v4501_v43 = vand.u32 4294901760, %v3794_v3 }
  0xf6   :  { %2502 = vmatprep.subr.bf16.mxu0 %v3343_v18  ;;  %v1290_v18 = vsub.f32 %v3759_v20, %v4340_v63  ;;  %v3839_v63 = vsub.f32 %v3777_v38, %v4344_v0  ;;  %v3854_v0 = vsub.f32 %v3787_v33, %v4346_v59  ;;  %v1304_v59 = vsub.f32 %v3799_v54, %v4502_v6  ;;  %v4506_v6 = vld [vmem:[#allocation15_spill] sm:$0xff]  ;;  %v4507_v54 = vld [vmem:[#allocation18_spill] sm:$0xff] }
  0xf7   :  { %4493 = vst [vmem:[#allocation55_spill] sm:$0xff] %v3834_v13  ;;  %4497 = vst [vmem:[#allocation13_spill] sm:$0xff] %v3849_v8  ;;  %v1185_v50 = vsub.f32 %v3794_v3, %v4501_v43  ;;  %v4504_v16 = vand.u32 4294901760, %v3812_v60  ;;  %v4505_v43 = vand.u32 4294901760, %v3814_v24  ;;  %v4513_v20 = vld [vmem:[#allocation19_spill] sm:$0xff] }
  0xf8   :  { %4494 = vst [vmem:[#allocation56_spill] sm:$0xff] %v3839_v63  ;;  %2544 = vmatpush3.bf16.msra.mxu1 %v4495_v22  ;;  %4498 = vst [vmem:[#allocation16_spill] sm:$0xff] %v3854_v0  ;;  %v4500_v22 = vand.u32 4294901760, %v3783_v53  ;;  %v1291_v23 = vand.u32 4294901760, %v1290_v18  ;;  %v1305_v3 = vand.u32 4294901760, %v1304_v59  ;;  %v4517_v59 = vand.u32 4294901760, %v3849_v8 }
  0xf9   :  { %2504 = vmatpush3.bf16.msra.mxu0 %v3349_v12  ;;  %2546 = vmatprep.subr.bf16.mxu1 %v4499_v28  ;;  %v4503_v28 = vld [vmem:[#allocation17_spill] sm:$0xff]  ;;  %v3878_v18 = vsub.f32 %v3812_v60, %v4504_v16  ;;  %v3883_v5 = vsub.f32 %v3814_v24, %v4505_v43  ;;  %v4509_v16 = vand.u32 4294901760, %v3818_v41  ;;  %v4511_v43 = vand.u32 4294901760, %v3828_v27 }
  0xfa   :  { %2506 = vmatprep.subr.bf16.mxu0 %v4496_v49  ;;  %v1178_v49 = vsub.f32 %v3783_v53, %v4500_v22  ;;  %v1186_v21 = vand.u32 4294901760, %v1185_v50  ;;  %v1318_v50 = vsub.f32 %v3849_v8, %v4517_v59 }
  0xfb   :  { %v3895_v53 = vsub.f32 %v3818_v41, %v4509_v16  ;;  %v4514_v16 = vand.u32 4294901760, %v3834_v13 }
  0xfc   :  { %2548 = vmatpush3.bf16.msra.mxu1 %v4506_v6  ;;  %v3901_v6 = vsub.f32 %v3828_v27, %v4511_v43  ;;  %v1179_v12 = vand.u32 4294901760, %v1178_v49 }
  0xfd   :  { %2508 = vmatpush3.bf16.msra.mxu0 %v4503_v28  ;;  %v4508_v28 = vand.u32 4294901760, %v3808_v2  ;;  %4510 = vst [vmem:[#allocation14_spill] sm:$0xff] %v3895_v53  ;;  %2550 = vmatprep.subr.bf16.mxu1 %v3289_v48  ;;  %v1192_v46 = vsub.f32 %v3834_v13, %v4514_v16  ;;  %v4515_v48 = vand.u32 4294901760, %v3839_v63  ;;  %v4521_v16 = vld [vmem:[#allocation21_spill] sm:$0xff] }
  0xfe   :  { %2510 = vmatprep.subr.bf16.mxu0 %v4507_v54  ;;  %4512 = vst [vmem:[#allocation17_spill] sm:$0xff] %v3901_v6 }
  0xff   :  { %v1311_v22 = vsub.f32 %v3808_v2, %v4508_v28  ;;  %v4369_v28 = vand.u32 4294901760, %v3870_v1  ;;  %v2589_v2 = vpack.c.bf16 %v1298_v37, %v1291_v23  ;;  %v1199_v47 = vsub.f32 %v3839_v63, %v4515_v48  ;;  %v4516_v37 = vld [vmem:[#allocation20_spill] sm:$0xff]  ;;  %v4519_v48 = vld [vmem:[#allocation27_spill] sm:$0xff] }
 0x100   :  { %2552 = vmatpush3.bf16.msra.mxu1 %v3295_v25  ;;  %v3926_v54 = vsub.f32 %v4519_v48, %v4519_v48  ;;  %v4523_v25 = vand.u32 4294901760, %v3883_v5 }
 0x101   :  { %2512 = vmatpush3.bf16.msra.mxu0 %v4513_v20  ;;  %v1312_v23 = vand.u32 4294901760, %v1311_v22  ;;  %v4518_v20 = vand.u32 4294901760, %v3854_v0  ;;  %2554 = vmatprep.subr.bf16.mxu1 %v3297_v31  ;;  %v4520_v22 = vand.u32 4294901760, %v3868_v62  ;;  %v3937_v59 = vsub.f32 %v3870_v1, %v4369_v28 }
 0x102   :  { %2514 = vmatprep.subr.bf16.mxu0 %v4516_v37  ;;  %v1193_v31 = vand.u32 4294901760, %v1192_v46  ;;  %v1200_v43 = vand.u32 4294901760, %v1199_v47  ;;  %v1213_v63 = vsub.f32 %v3883_v5, %v4523_v25  ;;  %v1319_v28 = vand.u32 4294901760, %v1318_v50  ;;  %v4527_v25 = vld [vmem:[#allocation26_spill] sm:$0xff]  ;;  %v4531_v47 = vld [vmem:[#allocation35_spill] sm:$0xff] }
 0x103   :  { %v1325_v49 = vsub.f32 %v3854_v0, %v4518_v20  ;;  %v3932_v37 = vsub.f32 %v3868_v62, %v4520_v22  ;;  %v2591_v20 = vpack.c.bf16 %v1186_v21, %v1179_v12  ;;  %v4522_v0 = vand.u32 4294901760, %v3878_v18  ;;  %v4524_v22 = vld [vmem:[#allocation22_spill] sm:$0xff] }
 0x104   :  { %2556 = vmatpush3.bf16.msra.mxu1 %v3301_v58  ;;  %v2593_v13 = vpack.c.bf16 %v1312_v23, %v1305_v3  ;;  %v4525_v21 = vand.u32 4294901760, %v3895_v53  ;;  %v4528_v3 = vld [vmem:[#allocation23_spill] sm:$0xff]  ;;  %v2595_v23 = vpack.c.bf16 %v1200_v43, %v1193_v31  ;;  %v4529_v50 = vand.u32 4294901760, %v3700_v19  ;;  %v4535_v19 = vld [vmem:[#allocation24_spill] sm:$0xff] }
 0x105   :  { %2516 = vmatpush3.bf16.msra.mxu0 %v4521_v16  ;;  %v1206_v8 = vsub.f32 %v3878_v18, %v4522_v0  ;;  %v1326_v35 = vand.u32 4294901760, %v1325_v49  ;;  %2590 = vmatprep.subr.bf16.mxu1 %v2589_v2  ;;  %v4526_v0 = vand.u32 4294901760, %v3901_v6  ;;  %v4530_v49 = vand.u32 4294901760, %v3702_v45 }
 0x106   :  { %2518 = vmatprep.subr.bf16.mxu0 %v4524_v22  ;;  %v1332_v46 = vsub.f32 %v3895_v53, %v4525_v21  ;;  %v1214_v21 = vand.u32 4294901760, %v1213_v63  ;;  %v4532_v58 = vand.u32 4294901760, %v4531_v47  ;;  %v4533_v53 = vld [vmem:[#allocation36_spill] sm:$0xff]  ;;  %v4536_v45 = vand.u32 4294901760, %v3926_v54 }
 0x107   :  { %v1339_v12 = vsub.f32 %v3901_v6, %v4526_v0  ;;  %1057 = vmatmul.mubr.f32.vlgmr.msra.gmra.mrb[4].mxu1 %v4527_v25  ;;  %v3963_v2 = vpack.c.bf16 %v4530_v49, %v4529_v50  ;;  %v1207_v22 = vand.u32 4294901760, %v1206_v8  ;;  %v2597_v0 = vpack.c.bf16 %v1326_v35, %v1319_v28 }
 0x108   :  { %2592 = vmatpush3.bf16.msra.mxu1 %v2591_v20  ;;  %1399 = vmatprep.mubr.f32.mxu1 %v4519_v48  ;;  %v1333_v16 = vand.u32 4294901760, %v1332_v46  ;;  %v1220_v6 = vsub.f32 %v4531_v47, %v4532_v58  ;;  %v1161_v63 = vsub.f32 %v3926_v54, %v4536_v45  ;;  %v4537_v20 = vand.u32 4294901760, %v3932_v37 }
 0x109   :  { %2520 = vmatpush3.bf16.msra.mxu0 %v4528_v3  ;;  %v4534_v3 = vand.u32 4294901760, %v4533_v53  ;;  %2594 = vmatprep.subr.bf16.mxu1 %v2593_v13  ;;  %v1340_v8 = vand.u32 4294901760, %v1339_v12  ;;  %v4538_v28 = vand.u32 4294901760, %v3937_v59  ;;  %v4539_v46 = vand.u32 4294901760, %v3733_v32  ;;  %v4541_v13 = vld [vmem:[#allocation25_spill] sm:$0xff] }
 0x10a   :  { %2522 = vmatprep.subr.bf16.mxu0 %v4535_v19  ;;  %v1346_v35 = vsub.f32 %v3932_v37, %v4537_v20  ;;  %v4540_v58 = vand.u32 4294901760, %v3743_v4  ;;  %v2599_v49 = vpack.c.bf16 %v1214_v21, %v1207_v22  ;;  %v4543_v12 = vand.u32 4294901760, %v3753_v39 }
 0x10b   :  { %v1227_v43 = vsub.f32 %v4533_v53, %v4534_v3  ;;  %v1353_v31 = vsub.f32 %v3937_v59, %v4538_v28  ;;  %v4542_v3 = vand.u32 4294901760, %v3745_v7  ;;  %v4544_v45 = vand.u32 4294901760, %v3529_v42 }
 0x10c   :  { %v3986_v50 = vpack.c.bf16 %v4540_v58, %v4539_v46  ;;  %v4545_v28 = vand.u32 4294901760, %v3534_v15  ;;  %2596 = vmatpush3.bf16.msra.mxu1 %v2595_v23  ;;  %v1221_v4 = vand.u32 4294901760, %v1220_v6  ;;  %v4546_v22 = vand.u32 4294901760, %v3549_v30 }
 0x10d   :  { %2524 = vmatpush3.bf16.msra.mxu0 %v4541_v13  ;;  %v3993_v19 = vpack.c.bf16 %v4543_v12, %v4542_v3  ;;  %v1234_v20 = vsub.f32 %v3529_v42, %v4544_v45  ;;  %v1228_v46 = vand.u32 4294901760, %v1227_v43  ;;  %v4547_v39 = vand.u32 4294901760, %v3554_v57  ;;  %2598 = vmatprep.subr.bf16.mxu1 %v2597_v0 }
 0x10e   :  { %v1241_v32 = vsub.f32 %v3534_v15, %v4545_v28  ;;  %2558 = vmatprep.subr.bf16.mxu0 %v3963_v2  ;;  %v1360_v7 = vsub.f32 %v3549_v30, %v4546_v22  ;;  %v1162_v58 = vand.u32 4294901760, %v1161_v63  ;;  %v2601_v13 = vpack.c.bf16 %v1340_v8, %v1333_v16 }
 0x10f   :  { %v1367_v21 = vsub.f32 %v3554_v57, %v4547_v39  ;;  %v1347_v3 = vand.u32 4294901760, %v1346_v35  ;;  %v1354_v12 = vand.u32 4294901760, %v1353_v31  ;;  %v4548_v23 = vand.u32 4294901760, %v3775_v17 }
 0x110   :  { %953 = vmatmul.mubr.f32.vlgmr.msra.gmra.mrb[4].mxu0 %v4527_v25  ;;  %v4549_v6 = vand.u32 4294901760, %v3777_v38  ;;  %v1235_v45 = vand.u32 4294901760, %v1234_v20  ;;  %v1242_v28 = vand.u32 4294901760, %v1241_v32  ;;  %v4550_v22 = vand.u32 4294901760, %v3581_v11  ;;  %2600 = vmatpush3.bf16.msra.mxu1 %v2599_v49 }
 0x111   :  { %2560 = vmatpush3.bf16.msra.mxu0 %v3986_v50  ;;  %1163 = vmatprep.mubr.f32.mxu0 %v1162_v58  ;;  %v4551_v16 = vand.u32 4294901760, %v3586_v44  ;;  %v2603_v17 = vpack.c.bf16 %v1228_v46, %v1221_v4  ;;  %v4552_v38 = vand.u32 4294901760, %v3785_v29  ;;  %v4553_v25 = vand.u32 4294901760, %v3787_v33 }
 0x112   :  { %v4013_v43 = vpack.c.bf16 %v4549_v6, %v4548_v23  ;;  %v1248_v0 = vsub.f32 %v3581_v11, %v4550_v22  ;;  %2562 = vmatprep.subr.bf16.mxu0 %v3993_v19  ;;  %v1361_v35 = vand.u32 4294901760, %v1360_v7  ;;  %v1368_v31 = vand.u32 4294901760, %v1367_v21  ;;  %2602 = vmatprep.subr.bf16.mxu1 %v2601_v13 }
 0x113   :  { %v1255_v63 = vsub.f32 %v3586_v44, %v4551_v16  ;;  %v4027_v8 = vpack.c.bf16 %v4553_v25, %v4552_v38  ;;  %v2605_v20 = vpack.c.bf16 %v1354_v12, %v1347_v3  ;;  %v4554_v32 = vand.u32 4294901760, %v3611_v56  ;;  %v4566_v38 = vld [vmem:[#allocation30_spill] sm:$0xff] }
 0x114   :  { %v4555_v58 = vand.u32 4294901760, %v3616_v26  ;;  %v4556_v4 = vand.u32 4294901760, %v3812_v60  ;;  %v4557_v29 = vand.u32 4294901760, %v3814_v24  ;;  %v2607_v33 = vpack.c.bf16 %v1242_v28, %v1235_v45  ;;  %2604 = vmatpush3.bf16.msra.mxu1 %v2603_v17 }
 0x115   :  { %v1374_v39 = vsub.f32 %v3611_v56, %v4554_v32  ;;  %2564 = vmatpush3.bf16.msra.mxu0 %v4013_v43  ;;  %v4558_v7 = vand.u32 4294901760, %v3818_v41  ;;  %v4559_v21 = vand.u32 4294901760, %v3828_v27  ;;  %v1249_v3 = vand.u32 4294901760, %v1248_v0  ;;  %2606 = vmatprep.subr.bf16.mxu1 %v2605_v20 }
 0x116   :  { %v1381_v49 = vsub.f32 %v3616_v26, %v4555_v58  ;;  %v4039_v46 = vpack.c.bf16 %v4557_v29, %v4556_v4  ;;  %v1256_v12 = vand.u32 4294901760, %v1255_v63  ;;  %2566 = vmatprep.subr.bf16.mxu0 %v4027_v8  ;;  %v2609_v23 = vpack.c.bf16 %v1368_v31, %v1361_v35  ;;  %v4564_v63 = vld [vmem:[#allocation29_spill] sm:$0xff] }
 0x117   :  { %v4046_v13 = vpack.c.bf16 %v4559_v21, %v4558_v7  ;;  %v4560_v60 = vand.u32 4294901760, %v3633_v34  ;;  %v4561_v6 = vand.u32 4294901760, %v3644_v14  ;;  %v1375_v41 = vand.u32 4294901760, %v1374_v39 }
 0x118   :  { %v1382_v28 = vand.u32 4294901760, %v1381_v49  ;;  %v4562_v27 = vand.u32 4294901760, %v3649_v51  ;;  %v4563_v0 = vand.u32 4294901760, %v3654_v55  ;;  %v4565_v17 = vand.u32 4294901760, %v4564_v63  ;;  %2608 = vmatpush3.bf16.msra.mxu1 %v2607_v33  ;;  %v4578_v63 = vld [vmem:[#allocation34_spill] sm:$0xff] }
 0x119   :  { %v1262_v24 = vsub.f32 %v3633_v34, %v4560_v60  ;;  %v1269_v45 = vsub.f32 %v3644_v14, %v4561_v6  ;;  %2568 = vmatpush3.bf16.msra.mxu0 %v4039_v46  ;;  %v4567_v25 = vand.u32 4294901760, %v4566_v38  ;;  %v2611_v31 = vpack.c.bf16 %v1256_v12, %v1249_v3  ;;  %2610 = vmatprep.subr.bf16.mxu1 %v2609_v23  ;;  %v4574_v60 = vld [vmem:[#allocation32_spill] sm:$0xff] }
 0x11a   :  { %v1388_v22 = vsub.f32 %v3649_v51, %v4562_v27  ;;  %v1395_v16 = vsub.f32 %v3654_v55, %v4563_v0  ;;  %v4568_v20 = vand.u32 4294901760, %v3868_v62  ;;  %v4569_v32 = vand.u32 4294901760, %v3870_v1  ;;  %2570 = vmatprep.subr.bf16.mxu0 %v4046_v13  ;;  %v4572_v1 = vld [vmem:[#allocation31_spill] sm:$0xff]  ;;  %v4576_v27 = vld [vmem:[#allocation33_spill] sm:$0xff] }
 0x11b   :  { %v4066_v35 = vpack.c.bf16 %v4567_v25, %v4565_v17  ;;  %v1263_v58 = vand.u32 4294901760, %v1262_v24  ;;  %v1270_v49 = vand.u32 4294901760, %v1269_v45  ;;  %v4570_v4 = vand.u32 4294901760, %v3667_v9  ;;  %v4582_v25 = vld [vmem:[#allocation12_spill] sm:$0xff] }
 0x11c   :  { %v4072_v39 = vpack.c.bf16 %v4569_v32, %v4568_v20  ;;  %v4571_v7 = vand.u32 4294901760, %v3672_v61  ;;  %v2613_v3 = vpack.c.bf16 %v1382_v28, %v1375_v41  ;;  %v1389_v62 = vand.u32 4294901760, %v1388_v22  ;;  %2612 = vmatpush3.bf16.msra.mxu1 %v2611_v31 }
 0x11d   :  { %v1276_v29 = vsub.f32 %v3667_v9, %v4570_v4  ;;  %v1396_v12 = vand.u32 4294901760, %v1395_v16  ;;  %2572 = vmatpush3.bf16.msra.mxu0 %v4066_v35  ;;  %v4573_v33 = vand.u32 4294901760, %v4572_v1  ;;  %v4575_v6 = vand.u32 4294901760, %v4574_v60  ;;  %v4580_v16 = vld [vmem:[#allocation11_spill] sm:$0xff] }
 0x11e   :  { %v1283_v21 = vsub.f32 %v3672_v61, %v4571_v7  ;;  %2574 = vmatprep.subr.bf16.mxu0 %v4072_v39  ;;  %v2615_v45 = vpack.c.bf16 %v1270_v49, %v1263_v58  ;;  %v4577_v0 = vand.u32 4294901760, %v4576_v27  ;;  %v4579_v17 = vand.u32 4294901760, %v4578_v63  ;;  %2614 = vmatprep.subr.bf16.mxu1 %v2613_v3  ;;  %v4591_v1 = vld [vmem:[#allocation39_spill] sm:$0xff] }
 0x11f   :  { %v4086_v24 = vpack.c.bf16 %v4575_v6, %v4573_v33  ;;  %v1277_v41 = vand.u32 4294901760, %v1276_v29  ;;  %v2617_v22 = vpack.c.bf16 %v1396_v12, %v1389_v62  ;;  %v4581_v38 = vand.u32 4294901760, %v4580_v16  ;;  %v4586_v29 = vld [vmem:[#allocation28_spill] sm:$0xff]  ;;  %v4595_v6 = vld [vmem:[#allocation41_spill] sm:$0xff] }
 0x120   :  { %v4093_v23 = vpack.c.bf16 %v4579_v17, %v4577_v0  ;;  %v1284_v28 = vand.u32 4294901760, %v1283_v21  ;;  %v4583_v20 = vand.u32 4294901760, %v4582_v25  ;;  %2616 = vmatpush3.bf16.msra.mxu1 %v2615_v45  ;;  %v4584_v58 = vand.u32 4294901760, %v3538_v52  ;;  %v4598_v17 = vld [vmem:[#allocation49_spill] sm:$0xff]  ;;  %v4601_v16 = vld [vmem:[#allocation52_spill] sm:$0xff] }
 0x121   :  { %2576 = vmatpush3.bf16.msra.mxu0 %v4086_v24  ;;  %v4585_v49 = vand.u32 4294901760, %v3540_v10  ;;  %v4111_v7 = vsub.f32 %v4586_v29, %v4586_v29  ;;  %2618 = vmatprep.subr.bf16.mxu1 %v2617_v22  ;;  %v4587_v21 = vand.u32 4294901760, %v3556_v36  ;;  %v4588_v3 = vand.u32 4294901760, %v3566_v40  ;;  %v4589_v10 = vld [vmem:[#allocation38_spill] sm:$0xff]  ;;  %v4593_v36 = vld [vmem:[#allocation40_spill] sm:$0xff]  ;;  %v4600_v22 = vld [vmem:[#allocation51_spill] sm:$0xff] }
 0x122   :  { %v4100_v31 = vpack.c.bf16 %v4583_v20, %v4581_v38  ;;  %2578 = vmatprep.subr.bf16.mxu0 %v4093_v23  ;;  %v2619_v32 = vpack.c.bf16 %v1284_v28, %v1277_v41  ;;  %v4590_v12 = vand.u32 4294901760, %v4589_v10  ;;  %v4592_v33 = vand.u32 4294901760, %v4591_v1  ;;  %v4599_v41 = vld [vmem:[#allocation50_spill] sm:$0xff]  ;;  %v4602_v20 = vld [vmem:[#allocation53_spill] sm:$0xff] }
 0x123   :  { %v4107_v4 = vpack.c.bf16 %v4585_v49, %v4584_v58  ;;  %v4118_v62 = vpack.c.bf16 %v4588_v3, %v4587_v21  ;;  %v1166_v52 = vand.u32 4294901760, %v4111_v7  ;;  %v4594_v40 = vand.u32 4294901760, %v4593_v36  ;;  %v4604_v49 = vld [vmem:[#allocation55_spill] sm:$0xff]  ;;  %v4605_v21 = vld [vmem:[#allocation56_spill] sm:$0xff]  ;;  %v4606_v10 = vld [vmem:[#allocation13_spill] sm:$0xff] }
 0x124   :  { %2620 = vmatpush3.bf16.msra.mxu1 %v2619_v32  ;;  %v4127_v60 = vpack.c.bf16 %v4592_v33, %v4590_v12  ;;  %v4596_v45 = vand.u32 4294901760, %v4595_v6  ;;  %v4597_v0 = vand.u32 4294901760, %v3926_v54  ;;  %v2621_v28 = vpack.c.bf16 %v4599_v41, %v4598_v17  ;;  %v4603_v32 = vld [vmem:[#allocation54_spill] sm:$0xff]  ;;  %v4607_v12 = vld [vmem:[#allocation16_spill] sm:$0xff] }
 0x125   :  { %2580 = vmatpush3.bf16.msra.mxu0 %v4100_v31  ;;  %2654 = vmatprep.subr.bf16.mxu1 %v3963_v2  ;;  %v1167_v63 = vsub.f32 %v4111_v7, %v1166_v52  ;;  %v2623_v38 = vpack.c.bf16 %v4601_v16, %v4600_v22  ;;  %v2625_v58 = vpack.c.bf16 %v4603_v32, %v4602_v20  ;;  %v4608_v36 = vld [vmem:[#allocation14_spill] sm:$0xff] }
 0x126   :  { %2582 = vmatprep.subr.bf16.mxu0 %v4107_v4  ;;  %v4135_v27 = vpack.c.bf16 %v4596_v45, %v4594_v40  ;;  %v2627_v3 = vpack.c.bf16 %v4605_v21, %v4604_v49  ;;  %v2629_v1 = vpack.c.bf16 %v4607_v12, %v4606_v10  ;;  %v2631_v33 = vpack.c.bf16 %v3883_v5, %v3878_v18 }
 0x127   :  { %1401 = vmatmul.mubr.f32.vlgmr.msra.gmra.mrb[6].mxu1 %v4586_v29  ;;  %v1168_v25 = vand.u32 4294901760, %v1167_v63  ;;  %v2635_v6 = vpack.c.bf16 %v4533_v53, %v4531_v47  ;;  %v2637_v45 = vpack.c.bf16 %v3937_v59, %v3932_v37  ;;  %v2641_v63 = vpack.c.bf16 %v3554_v57, %v3549_v30 }
 0x128   :  { %2656 = vmatpush3.bf16.msra.mxu1 %v3986_v50  ;;  %1643 = vmatprep.mubr.f32.mxu1 %v4597_v0  ;;  %v2639_v0 = vpack.c.bf16 %v3534_v15, %v3529_v42  ;;  %v2643_v53 = vpack.c.bf16 %v3586_v44, %v3581_v11  ;;  %v2645_v47 = vpack.c.bf16 %v3616_v26, %v3611_v56  ;;  %v4610_v42 = vand.u32 4294901760, %v4598_v17 }
 0x129   :  { %2584 = vmatpush3.bf16.msra.mxu0 %v4118_v62  ;;  %2658 = vmatprep.subr.bf16.mxu1 %v3993_v19  ;;  %v2647_v15 = vpack.c.bf16 %v3644_v14, %v3633_v34  ;;  %v2649_v30 = vpack.c.bf16 %v3654_v55, %v3649_v51  ;;  %v2651_v57 = vpack.c.bf16 %v3672_v61, %v3667_v9  ;;  %v4611_v44 = vand.u32 4294901760, %v4599_v41  ;;  %v4627_v41 = vld [vmem:[#allocation42_spill] sm:$0xff] }
 0x12a   :  { %2586 = vmatprep.subr.bf16.mxu0 %v4127_v60  ;;  %v4612_v55 = vand.u32 4294901760, %v4600_v22  ;;  %v4613_v26 = vand.u32 4294901760, %v4601_v16  ;;  %v4614_v56 = vand.u32 4294901760, %v4602_v20  ;;  %v4615_v34 = vand.u32 4294901760, %v4603_v32 }
 0x12b   :  { %v2685_v11 = vpack.c.bf16 %v4611_v44, %v4610_v42  ;;  %v4616_v9 = vand.u32 4294901760, %v4604_v49  ;;  %v4617_v61 = vand.u32 4294901760, %v4605_v21 }
 0x12c   :  { %2660 = vmatpush3.bf16.msra.mxu1 %v4013_v43  ;;  %v2687_v14 = vpack.c.bf16 %v4613_v26, %v4612_v55  ;;  %v2689_v51 = vpack.c.bf16 %v4615_v34, %v4614_v56 }
 0x12d   :  { %2588 = vmatpush3.bf16.msra.mxu0 %v4135_v27  ;;  %2662 = vmatprep.subr.bf16.mxu1 %v4027_v8 }
 0x12e   :  { %2622 = vmatprep.subr.bf16.mxu0 %v2621_v28 }
 0x130   :  { %1169 = vmatmul.mubr.f32.vlgmr.msra.gmra.mrb[6].mxu0 %v1168_v25  ;;  %2664 = vmatpush3.bf16.msra.mxu1 %v4039_v46 }
 0x131   :  { %2624 = vmatpush3.bf16.msra.mxu0 %v2623_v38  ;;  %1536 = vmatprep.mubr.f32.mxu0 %v3926_v54  ;;  %v4609_v54 = vld [vmem:[#allocation17_spill] sm:$0xff] }
 0x132   :  { %2626 = vmatprep.subr.bf16.mxu0 %v2625_v58  ;;  %2666 = vmatprep.subr.bf16.mxu1 %v4046_v13  ;;  %v2633_v40 = vpack.c.bf16 %v4609_v54, %v4608_v36 }
 0x134   :  { %2668 = vmatpush3.bf16.msra.mxu1 %v4066_v35 }
 0x135   :  { %2628 = vmatpush3.bf16.msra.mxu0 %v2627_v3  ;;  %2670 = vmatprep.subr.bf16.mxu1 %v4072_v39 }
 0x136   :  { %2630 = vmatprep.subr.bf16.mxu0 %v2629_v1 }
 0x138   :  { %2672 = vmatpush3.bf16.msra.mxu1 %v4086_v24 }
 0x139   :  { %2632 = vmatpush3.bf16.msra.mxu0 %v2631_v33  ;;  %2674 = vmatprep.subr.bf16.mxu1 %v4093_v23 }
 0x13a   :  { %2634 = vmatprep.subr.bf16.mxu0 %v2633_v40 }
 0x13c   :  { %2676 = vmatpush3.bf16.msra.mxu1 %v4100_v31 }
 0x13d   :  { %2636 = vmatpush3.bf16.msra.mxu0 %v2635_v6  ;;  %2678 = vmatprep.subr.bf16.mxu1 %v4107_v4 }
 0x13e   :  { %2638 = vmatprep.subr.bf16.mxu0 %v2637_v45 }
 0x140   :  { %2680 = vmatpush3.bf16.msra.mxu1 %v4118_v62 }
 0x141   :  { %2640 = vmatpush3.bf16.msra.mxu0 %v2639_v0  ;;  %2682 = vmatprep.subr.bf16.mxu1 %v4127_v60 }
 0x142   :  { %2642 = vmatprep.subr.bf16.mxu0 %v2641_v63 }
 0x144   :  { %2684 = vmatpush3.bf16.msra.mxu1 %v4135_v27 }
 0x145   :  { %2644 = vmatpush3.bf16.msra.mxu0 %v2643_v53  ;;  %2718 = vmatprep.subr.bf16.mxu1 %v3963_v2  ;;  %v2691_v2 = vpack.c.bf16 %v4617_v61, %v4616_v9 }
 0x146   :  { %2646 = vmatprep.subr.bf16.mxu0 %v2645_v47 }
 0x147   :  { %1647 = vmatmul.mubr.f32.vlgmr.msra.gmra.mrb[8].mxu1 %v1166_v52  ;;  %v4622_v52 = vand.u32 4294901760, %v4608_v36 }
 0x148   :  { %2720 = vmatpush3.bf16.msra.mxu1 %v3986_v50  ;;  %1917 = vmatprep.mubr.f32.mxu1 %v4519_v48  ;;  %v4618_v50 = vand.u32 4294901760, %v4606_v10 }
 0x149   :  { %2648 = vmatpush3.bf16.msra.mxu0 %v2647_v15  ;;  %2722 = vmatprep.subr.bf16.mxu1 %v3993_v19  ;;  %v4619_v19 = vand.u32 4294901760, %v4607_v12 }
 0x14a   :  { %2650 = vmatprep.subr.bf16.mxu0 %v2649_v30 }
 0x14c   :  { %2724 = vmatpush3.bf16.msra.mxu1 %v4013_v43  ;;  %v2693_v43 = vpack.c.bf16 %v4619_v19, %v4618_v50 }
 0x14d   :  { %2652 = vmatpush3.bf16.msra.mxu0 %v2651_v57  ;;  %2726 = vmatprep.subr.bf16.mxu1 %v4027_v8  ;;  %v4620_v8 = vand.u32 4294901760, %v3878_v18  ;;  %v4625_v18 = vand.u32 4294901760, %v3937_v59  ;;  %v4630_v59 = vld [vmem:[#allocation45_spill] sm:$0xff] }
 0x14e   :  { %2686 = vmatprep.subr.bf16.mxu0 %v2685_v11 }
 0x150   :  { %1539 = vmatmul.mubr.f32.vlgmr.msra.gmra.mrb[8].mxu0 %v4111_v7  ;;  %2728 = vmatpush3.bf16.msra.mxu1 %v4039_v46  ;;  %v4623_v46 = vand.u32 4294901760, %v4609_v54 }
 0x151   :  { %2688 = vmatpush3.bf16.msra.mxu0 %v2687_v14  ;;  %1813 = vmatprep.mubr.f32.mxu0 %v4519_v48  ;;  %v4621_v48 = vand.u32 4294901760, %v3883_v5 }
 0x152   :  { %2690 = vmatprep.subr.bf16.mxu0 %v2689_v51  ;;  %2730 = vmatprep.subr.bf16.mxu1 %v4046_v13  ;;  %v2697_v17 = vpack.c.bf16 %v4623_v46, %v4622_v52  ;;  %v4624_v13 = vand.u32 4294901760, %v3932_v37  ;;  %v4629_v37 = vld [vmem:[#allocation44_spill] sm:$0xff] }
 0x153   :  { %v2695_v7 = vpack.c.bf16 %v4621_v48, %v4620_v8 }
 0x154   :  { %2732 = vmatpush3.bf16.msra.mxu1 %v4066_v35  ;;  %v2701_v5 = vpack.c.bf16 %v4625_v18, %v4624_v13  ;;  %v4626_v35 = vld [vmem:[#allocation37_spill] sm:$0xff] }
 0x155   :  { %2692 = vmatpush3.bf16.msra.mxu0 %v2691_v2  ;;  %2734 = vmatprep.subr.bf16.mxu1 %v4072_v39  ;;  %v4628_v39 = vld [vmem:[#allocation43_spill] sm:$0xff] }
 0x156   :  { %2694 = vmatprep.subr.bf16.mxu0 %v2693_v43 }
 0x158   :  { %2736 = vmatpush3.bf16.msra.mxu1 %v4086_v24  ;;  %v4631_v24 = vld [vmem:[#allocation46_spill] sm:$0xff] }
 0x159   :  { %2696 = vmatpush3.bf16.msra.mxu0 %v2695_v7  ;;  %2738 = vmatprep.subr.bf16.mxu1 %v4093_v23  ;;  %v4632_v23 = vld [vmem:[#allocation47_spill] sm:$0xff] }
 0x15a   :  { %2698 = vmatprep.subr.bf16.mxu0 %v2697_v17 }
 0x15c   :  { %2740 = vmatpush3.bf16.msra.mxu1 %v4100_v31  ;;  %v4633_v31 = vld [vmem:[#allocation48_spill] sm:$0xff] }
 0x15d   :  { %2700 = vmatpush3.bf16.msra.mxu0 %v4626_v35  ;;  %2742 = vmatprep.subr.bf16.mxu1 %v4107_v4 }
 0x15e   :  { %2702 = vmatprep.subr.bf16.mxu0 %v2701_v5 }
 0x160   :  { %2744 = vmatpush3.bf16.msra.mxu1 %v4118_v62 }
 0x161   :  { %2704 = vmatpush3.bf16.msra.mxu0 %v4627_v41  ;;  %2746 = vmatprep.subr.bf16.mxu1 %v4127_v60 }
 0x162   :  { %2706 = vmatprep.subr.bf16.mxu0 %v4628_v39 }
 0x164   :  { %2748 = vmatpush3.bf16.msra.mxu1 %v4135_v27 }
 0x165   :  { %2708 = vmatpush3.bf16.msra.mxu0 %v4629_v37 }
 0x166   :  { %2710 = vmatprep.subr.bf16.mxu0 %v4630_v59 }
 0x167   :  { %1919 = vmatmul.mubr.f32.vlgmr.msra.gmra.mrb[10].mxu1 %v4586_v29 }
 0x169   :  { %2712 = vmatpush3.bf16.msra.mxu0 %v4631_v24 }
 0x16a   :  { %2714 = vmatprep.subr.bf16.mxu0 %v4632_v23 }
 0x16d   :  { %2716 = vmatpush3.bf16.msra.mxu0 %v4633_v31 }
 0x170   :  { %1815 = vmatmul.mubr.f32.vlgmr.msra.gmra.mrb[10].mxu0 %v4586_v29 }
 0x19a   :  { %v2012_v4 = vpop.f32.mrb[0].mxu1 }
 0x19b   :  { %v2013_v62 = vpop.f32.mrb[1].mxu1 }
 0x19c   :  { %v2014_v28 = vadd.f32 %v2013_v62, %v2012_v4 }
 0x1a2   :  { %v1977_v60 = vpop.f32.mrb[0].mxu0 }
 0x1a3   :  { %v1978_v22 = vpop.f32.mrb[1].mxu0 }
 0x1a4   :  { %v1979_v16 = vadd.f32 %v1978_v22, %v1977_v60 }
 0x1a6   :  { %v541_v38 = vadd.f32 %v2014_v28, %v1979_v16 }
 0x1ba   :  { %v2082_v27 = vpop.f32.mrb[2].mxu1 }
 0x1bb   :  { %v2083_v25 = vpop.f32.mrb[3].mxu1 }
 0x1bc   :  { %v2084_v20 = vadd.f32 %v2083_v25, %v2082_v27 }
 0x1c3   :  { %v2047_v32 = vpop.f32.mrb[2].mxu0 }
 0x1c4   :  { %v2048_v58 = vpop.f32.mrb[3].mxu0 }
 0x1c5   :  { %v2049_v49 = vadd.f32 %v2048_v58, %v2047_v32 }
 0x1c7   :  { %v679_v21 = vadd.f32 %v2049_v49, %v541_v38 }
 0x1c9   :  { %v787_v3 = vadd.f32 %v2084_v20, %v679_v21 }
 0x1da   :  { %v2152_v10 = vpop.f32.mrb[4].mxu1 }
 0x1db   :  { %v2153_v12 = vpop.f32.mrb[5].mxu1 }
 0x1dc   :  { %v2154_v1 = vadd.f32 %v2153_v12, %v2152_v10 }
 0x1e3   :  { %v2117_v33 = vpop.f32.mrb[4].mxu0 }
 0x1e4   :  { %v2118_v29 = vpop.f32.mrb[5].mxu0 }
 0x1e5   :  { %v2119_v36 = vadd.f32 %v2118_v29, %v2117_v33 }
 0x1e7   :  { %v955_v54 = vadd.f32 %v2119_v36, %v787_v3 }
 0x1e9   :  { %v1059_v40 = vadd.f32 %v2154_v1, %v955_v54 }
 0x1fa   :  { %v2222_v6 = vpop.f32.mrb[6].mxu1 }
 0x1fb   :  { %v2223_v45 = vpop.f32.mrb[7].mxu1 }
 0x1fc   :  { %v2224_v0 = vadd.f32 %v2223_v45, %v2222_v6 }
 0x203   :  { %v2187_v63 = vpop.f32.mrb[6].mxu0 }
 0x204   :  { %v2188_v53 = vpop.f32.mrb[7].mxu0 }
 0x205   :  { %v2189_v47 = vadd.f32 %v2188_v53, %v2187_v63 }
 0x207   :  { %v1171_v15 = vadd.f32 %v2189_v47, %v1059_v40 }
 0x209   :  { %v1403_v30 = vadd.f32 %v2224_v0, %v1171_v15 }
 0x21a   :  { %v2292_v57 = vpop.f32.mrb[8].mxu1 }
 0x21b   :  { %v2293_v42 = vpop.f32.mrb[9].mxu1 }
 0x21c   :  { %v2294_v44 = vadd.f32 %v2293_v42, %v2292_v57 }
 0x223   :  { %v2257_v11 = vpop.f32.mrb[8].mxu0 }
 0x224   :  { %v2258_v55 = vpop.f32.mrb[9].mxu0 }
 0x225   :  { %v2259_v26 = vadd.f32 %v2258_v55, %v2257_v11 }
 0x227   :  { %v1541_v14 = vadd.f32 %v2259_v26, %v1403_v30 }
 0x229   :  { %v1649_v56 = vadd.f32 %v2294_v44, %v1541_v14 }
 0x23a   :  { %v2362_v34 = vpop.f32.mrb[10].mxu1 }
 0x23b   :  { %v2363_v51 = vpop.f32.mrb[11].mxu1 }
 0x23c   :  { %v2364_v9 = vadd.f32 %v2363_v51, %v2362_v34 }
 0x243   :  { %v2327_v61 = vpop.f32.mrb[10].mxu0 }
 0x244   :  { %v2328_v2 = vpop.f32.mrb[11].mxu0 }
 0x245   :  { %v2329_v50 = vadd.f32 %v2328_v2, %v2327_v61 }
 0x247   :  { %v1817_v19 = vadd.f32 %v2329_v50, %v1649_v56 }
 0x249   :  { %v1921_v43 = vadd.f32 %v2364_v9, %v1817_v19 }
 0x24b   :  { %1924 = vst [vmem:[#allocation7] sm:$0xff] %v1921_v43 }
 0x24c   :  { %2827 = shalt.err (!%p2824_p6)
}
 0x24d   :  { %s2828_s10 = scalar_lea.hbm %s4265_s2, 128 }
 0x24e   :  { %p2829_p7 = scmp.ne.s32.totalorder %s4265_s2, %s2828_s10  ;;  %p2832_p8 = scmp.lt.u32.totalorder %s2828_s10, %s4265_s2 }
 0x250   :  { %p2834_p9 = pnand %p2832_p8, %p2829_p7 }
 0x252   :  { %2837 = shalt.err (!%p2834_p9)
}
 0x253   :  { %1934 = dma.vmem_to_hbm [thread:$0]  %s1932_s6, 128, %s4265_s2, [#allocation4]  }
 0x254   :  { %2842 = dma.done.wait [#allocation4], 128  }
 0x255   :  { %2843 = vsyncadd [#allocation4], 4294967168 }
 0x256   :  { %1938 = vsyncpa [#allocation3], 1 }
 0x257   :  { %1939 = vsyncpa [#allocation6], 1 }
 0x258   :  { %1940 = vsyncpa [#allocation4], 1 }

</bundles_post_ra>
